<compile_context>
chip_gen: v7x
topology: tpu7x:2x2x1
jax: 0.10.0
libtpu: 0.0.40
codegen_flags: <defaults>
</compile_context>

<pallas_src>
import numpy as np
import jax
import jax.numpy as jnp
from jax.experimental import pallas as pl
from jax.experimental.pallas import tpu as pltpu

LANE = 128      # TPU lane width
SUB = 16        # bf16 sublane tile -> every slab block offset is 16-aligned

# Cnet channel configuration (simplified MobileNetV3_Small stand-in)
C_STEM = 16     # stem conv output channels
C_PW = 64       # pointwise conv output channels
C_HEAD = 128    # Cnet feature width
C_FC1 = 256     # fclayer hidden width


# ----------------------------------------------------------------------------
# Fused kernel (built per geometry; all offsets are compile-time constants)
# ----------------------------------------------------------------------------
def _make_kernel(cfg):
    B, Ho, Wo = cfg["B"], cfg["Ho"], cfg["Wo"]
    WC, BH, BHo = cfg["WC"], cfg["BH"], cfg["BHo"]
    KN, LW, LP = cfg["KN"], cfg["LW"], cfg["LP"]
    o = cfg  # flat dict also holds slab row offsets

    def kernel(x_ref, num_ref, w128_ref, wide_ref, cst_ref, out_ref):
        f32, bf16 = jnp.float32, jnp.bfloat16

        def hswish(y):
            return y * jnp.clip(y + 3.0, 0.0, 6.0) * (1.0 / 6.0)

        def relu(y):
            return jnp.maximum(y, 0.0)

        def bias(i, width):                       # folded biases, f32, (1, width)
            return cst_ref[8 * i:8 * i + 1, 0:width]

        # ---- Cnet stem: 3x3 / stride-2 / pad-1 conv ----------------------------
        # rows:   0/1 selection matmul (stride-2 + kh offset + row zero-pad)
        # cols:   banded weight matrix (stride-2 + kw offset + col zero-pad)
        x = x_ref[...].astype(bf16)                               # (B*H, W*C)
        h = jnp.zeros((BHo, LW), f32)
        for kh in range(3):
            r0 = o["sel_row"] + kh * BHo
            sel = cst_ref[r0:r0 + BHo, 0:BH].astype(bf16)         # (B*Ho, B*H)
            t = jnp.dot(sel, x, preferred_element_type=f32)       # gathered rows
            h = h + jnp.dot(
                t.astype(bf16),
                w128_ref[o["wrow"] + kh * WC:o["wrow"] + (kh + 1) * WC, :],
                preferred_element_type=f32)
        h = hswish(h + bias(0, LW))                               # (B*Ho, Wo*16)

        # ---- Cnet 1x1 pointwise conv (block-diagonal over the Wo columns) ------
        pw = jnp.dot(h.astype(bf16), wide_ref[o["pw"]:o["pw"] + LW, :],
                     preferred_element_type=f32)
        pw = hswish(pw + bias(1, LP))                             # (B*Ho, Wo*64)

        # ---- global average pool folded with the head linear (both linear) -----
        pr = jnp.dot(pw.astype(bf16), w128_ref[o["ah"]:o["ah"] + LP, :],
                     preferred_element_type=f32)                  # (B*Ho, 128)
        poolm = cst_ref[o["pool_row"]:o["pool_row"] + B, 0:BHo].astype(bf16)
        pooled = jnp.dot(poolm, pr.astype(bf16), preferred_element_type=f32)
        img_feat = hswish(pooled + bias(2, C_HEAD))               # (B, 128)

        # ---- Lnet ---------------------------------------------------------------
        n = num_ref[...].astype(bf16)                             # (B, K_num)
        n = relu(jnp.dot(n, w128_ref[o["l1"]:o["l1"] + KN, :],
                         preferred_element_type=f32) + bias(3, C_HEAD))
        n = relu(jnp.dot(n.astype(bf16), w128_ref[o["l2"]:o["l2"] + C_HEAD, :],
                         preferred_element_type=f32) + bias(4, C_HEAD))

        # ---- fclayer (concat replaced by split-weight sum) ----------------------
        x1 = (jnp.dot(img_feat.astype(bf16),
                      wide_ref[o["f1"]:o["f1"] + C_HEAD, :],
                      preferred_element_type=f32)
              + jnp.dot(n.astype(bf16),
                        wide_ref[o["f1"] + C_HEAD:o["f1"] + 2 * C_HEAD, :],
                        preferred_element_type=f32)
              + bias(5, LP))
        x1 = relu(x1)                                             # (B, LP); cols >= 256 stay 0
        out_ref[...] = (jnp.dot(x1.astype(bf16),
                                w128_ref[o["f2"]:o["f2"] + LP, :],
                                preferred_element_type=f32)
                        + bias(6, LANE))                          # (B, 128); col 0 = result

    return kernel


def build_forward(cfg):
    kernel = _make_kernel(cfg)
    B, H, W, C = cfg["B"], cfg["H"], cfg["W"], cfg["C"]
    vmem_bytes = cfg["vmem_bytes"]

    @jax.jit
    def forward(w128, wwide, cst, img_nhwc, num):
        # Contiguous NHWC -> (B*H, W*C) is a free view; no wrapper compute.
        x2d = img_nhwc.astype(jnp.float32).reshape(B * H, W * C)
        out = pl.pallas_call(
            kernel,
            in_specs=[pl.BlockSpec(memory_space=pltpu.MemorySpace.VMEM)] * 5,
            out_specs=pl.BlockSpec(memory_space=pltpu.MemorySpace.VMEM),
            out_shape=jax.ShapeDtypeStruct((B, LANE), jnp.float32),
            compiler_params=pltpu.CompilerParams(vmem_limit_bytes=vmem_bytes),
        )(x2d, num.astype(jnp.float32), w128, wwide, cst)
        return out[:, 0]                        # == torch.squeeze of the (B, 1) result

    return forward


# ----------------------------------------------------------------------------
# Parameters (deterministic, synthetic) + one-time prep (BN fold + slab packing)
# ----------------------------------------------------------------------------
def _bn_fold_np(gamma, beta, mean, var, eps=1e-5):
    scale = gamma / jnp.sqrt(var + eps)
    shift = beta - mean * scale
    return scale, shift


def init_params(key, c_img, k_num):
    ks = jax.random.split(key, 16)
    s = 0.1

    def lin(k, fan_in, fan_out):
        kw, kb = jax.random.split(k)
        return (jax.random.normal(kw, (fan_in, fan_out), jnp.float32) * s,
                jax.random.normal(kb, (fan_out,), jnp.float32) * s)

    def bn(k, n):
        k1, k2, k3, k4 = jax.random.split(k, 4)
        gamma = 1.0 + 0.1 * jax.random.normal(k1, (n,), jnp.float32)
        beta = 0.1 * jax.random.normal(k2, (n,), jnp.float32)
        mean = 0.1 * jax.random.normal(k3, (n,), jnp.float32)
        var = 1.0 + 0.1 * jax.random.uniform(k4, (n,), jnp.float32)
        return _bn_fold_np(gamma, beta, mean, var)

    p = {}
    p["stem_w"], p["stem_b"] = lin(ks[0], 9 * c_img, C_STEM)
    p["stem_bn"] = bn(ks[1], C_STEM)
    p["pw_w"], p["pw_b"] = lin(ks[2], C_STEM, C_PW)
    p["pw_bn"] = bn(ks[3], C_PW)
    p["head_w"], p["head_b"] = lin(ks[4], C_PW, C_HEAD)
    p["l1_w"], p["l1_b"] = lin(ks[5], k_num, 128)
    p["l1_bn"] = bn(ks[6], 128)
    p["l2_w"], p["l2_b"] = lin(ks[7], 128, 128)
    p["l2_bn"] = bn(ks[8], 128)
    p["f1_w"], p["f1_b"] = lin(ks[9], 256, 256)
    p["f1_bn"] = bn(ks[10], 256)
    p["f2_w"], p["f2_b"] = lin(ks[11], 256, 1)
    return p


def prepare_params(p, *, batch, height, width, c_img, k_num):
    """One-time: fold BN, build conv selection/banded/block-diag matrices,
    pack everything into 2 bf16 weight slabs + 1 f32 constant slab."""
    B, H, W, C, KN = batch, height, width, c_img, k_num
    Ho = (H + 2 - 3) // 2 + 1
    Wo = (W + 2 - 3) // 2 + 1
    S = Ho * Wo
    WC, BH, BHo = W * C, B * H, B * Ho
    LW, LP = Wo * C_STEM, Wo * C_PW

    # Packing assumes the toy geometry keeps conv-domain lane widths aligned
    # with the feature widths (true for H=W=16): LW==128, LP==512.
    assert LW == C_HEAD == LANE and LP >= C_FC1 and LP % LANE == 0
    assert BH <= LP and BHo <= LP

    def fold(w, b, bn=None):
        w = np.asarray(w, np.float32)
        b = np.asarray(b, np.float32)
        if bn is not None:
            sc = np.asarray(bn[0], np.float32)
            sh = np.asarray(bn[1], np.float32)
            w = w * sc[None, :]
            b = b * sc + sh
        return w, b

    stem_w, stem_b = fold(p["stem_w"], p["stem_b"], p["stem_bn"])   # (9C, 16)
    pw_w, pw_b = fold(p["pw_w"], p["pw_b"], p["pw_bn"])             # (16, 64)
    head_w, head_b = fold(p["head_w"], p["head_b"])                 # (64, 128)
    l1_w, l1_b = fold(p["l1_w"], p["l1_b"], p["l1_bn"])             # (KN, 128)
    l2_w, l2_b = fold(p["l2_w"], p["l2_b"], p["l2_bn"])             # (128, 128)
    f1_w, f1_b = fold(p["f1_w"], p["f1_b"], p["f1_bn"])             # (256, 256)
    f2_w, f2_b = fold(p["f2_w"], p["f2_b"])                         # (256, 1)

    # Banded stem weight per kh: column stride-2 / kw offset / zero-pad folded in.
    w4 = stem_w.reshape(3, 3, C, C_STEM)
    wrow = np.zeros((3, WC, LW), np.float32)
    for kh in range(3):
        for kw in range(3):
            for j in range(Wo):
                w_in = 2 * j + kw - 1
                if 0 <= w_in < W:
                    wrow[kh, w_in * C:(w_in + 1) * C,
                         j * C_STEM:(j + 1) * C_STEM] = w4[kh, kw]

    # Row-selection matrices (stride-2 / kh offset / zero-pad), block-diag over batch.
    sel = np.zeros((3, BHo, BH), np.float32)
    for kh in range(3):
        for b in range(B):
            for i in range(Ho):
                r = 2 * i + kh - 1
                if 0 <= r < H:
                    sel[kh, b * Ho + i, b * H + r] = 1.0

    # Block-diagonal 1x1 pointwise conv.
    pwblk = np.zeros((LW, LP), np.float32)
    for j in range(Wo):
        pwblk[j * C_STEM:(j + 1) * C_STEM, j * C_PW:(j + 1) * C_PW] = pw_w

    # Global-average-pool scale folded into the head weight, tiled over spatial cols.
    ah = np.tile(head_w, (Wo, 1)) / float(S)                        # (LP, 128)

    # Per-batch row pooling matrix.
    poolm = np.zeros((B, BHo), np.float32)
    for b in range(B):
        poolm[b, b * Ho:(b + 1) * Ho] = 1.0

    def rup(n, m=SUB):
        return ((n + m - 1) // m) * m

    # ---- slab #1 (bf16, 128 lanes): stem bands, pool+head, l2, l1, f2 ----
    off = {"wrow": 0}
    off["ah"] = rup(3 * WC)
    off["l2"] = rup(off["ah"] + LP)
    off["l1"] = rup(off["l2"] + C_HEAD)
    off["f2"] = rup(off["l1"] + KN)
    n128 = rup(off["f2"] + LP)
    w128 = np.zeros((n128, LANE), np.float32)
    for kh in range(3):
        w128[off["wrow"] + kh * WC:off["wrow"] + (kh + 1) * WC, :LW] = wrow[kh]
    w128[off["ah"]:off["ah"] + LP, :C_HEAD] = ah
    w128[off["l2"]:off["l2"] + C_HEAD, :C_HEAD] = l2_w
    w128[off["l1"]:off["l1"] + KN, :C_HEAD] = l1_w
    w128[off["f2"]:off["f2"] + C_FC1, :f2_w.shape[1]] = f2_w        # col 0 only

    # ---- slab #2 (bf16, LP lanes): block-diag pointwise conv + f1 (split halves) ----
    offw = {"pw": 0, "f1": rup(LW)}
    nwide = rup(offw["f1"] + C_FC1)
    wwide = np.zeros((nwide, LP), np.float32)
    wwide[offw["pw"]:offw["pw"] + LW, :] = pwblk
    wwide[offw["f1"]:offw["f1"] + C_FC1, :C_FC1] = f1_w             # padded cols stay 0

    # ---- slab #3 (f32, LP lanes): folded biases (8-row stripes) + sel + poolm ----
    sel_row = 8 * 7
    pool_row = sel_row + rup(3 * BHo, 8)
    ncst = pool_row + rup(B, 8)
    cst = np.zeros((ncst, LP), np.float32)
    cst[0, :LW] = np.tile(stem_b, Wo)       # bias 0: stem  (col layout j*16+o)
    cst[8, :LP] = np.tile(pw_b, Wo)         # bias 1: pw    (col layout j*64+co)
    cst[16, :C_HEAD] = head_b               # bias 2: head
    cst[24, :C_HEAD] = l1_b                 # bias 3: l1
    cst[32, :C_HEAD] = l2_b                 # bias 4: l2
    cst[40, :C_FC1] = f1_b                  # bias 5: f1 (padded region zero -> relu keeps it 0)
    cst[48, 0] = float(f2_b.reshape(-1)[0]) # bias 6: f2
    for kh in range(3):
        cst[sel_row + kh * BHo:sel_row + (kh + 1) * BHo, :BH] = sel[kh]
    cst[pool_row:pool_row + B, :BHo] = poolm

    # VMEM budget derived from the actual buffers (+ headroom), not a blanket limit.
    nbytes = (w128.size * 2 + wwide.size * 2 + cst.size * 4
              + BH * WC * 4 + B * KN * 4 + B * LANE * 4)
    cfg = dict(B=B, H=H, W=W, C=C, KN=KN, Ho=Ho, Wo=Wo, WC=WC, BH=BH, BHo=BHo,
               LW=LW, LP=LP, sel_row=sel_row, pool_row=pool_row,
               wrow=off["wrow"], ah=off["ah"], l2=off["l2"], l1=off["l1"],
               f2=off["f2"], pw=offw["pw"], f1=offw["f1"],
               vmem_bytes=int(2 * nbytes + 4 * 1024 * 1024))

    return {"w128": jnp.asarray(w128, jnp.bfloat16),
            "wwide": jnp.asarray(wwide, jnp.bfloat16),
            "cst": jnp.asarray(cst, jnp.float32),
            "cfg": cfg}


# ----------------------------------------------------------------------------
# Pure-JAX reference (unfused, f32, straightforward im2col) for correctness
# ----------------------------------------------------------------------------
def im2col_3x3_s2(x_nhwc):
    B, H, W, C = x_nhwc.shape
    Ho, Wo = (H + 2 - 3) // 2 + 1, (W + 2 - 3) // 2 + 1
    xp = jnp.pad(x_nhwc, ((0, 0), (1, 1), (1, 1), (0, 0)))
    cols = []
    for kh in range(3):
        for kw in range(3):
            cols.append(xp[:, kh:kh + 2 * Ho:2, kw:kw + 2 * Wo:2, :])
    patches = jnp.concatenate(cols, axis=-1)
    return patches.reshape(B * Ho * Wo, 9 * C), (B, Ho, Wo)


def net_forward_reference(p, img_nhwc, num):
    def bn_apply(x, bn):
        scale, shift = bn
        return x * scale + shift

    def hswish(y):
        return y * jnp.clip(y + 3.0, 0.0, 6.0) / 6.0

    patches, (B, Ho, Wo) = im2col_3x3_s2(img_nhwc)
    h = hswish(bn_apply(patches @ p["stem_w"] + p["stem_b"], p["stem_bn"]))
    h = hswish(bn_apply(h @ p["pw_w"] + p["pw_b"], p["pw_bn"]))
    h = h.reshape(B, Ho * Wo, -1).mean(axis=1)
    img_feat = hswish(h @ p["head_w"] + p["head_b"])
    n = jnp.maximum(bn_apply(num.astype(jnp.float32) @ p["l1_w"] + p["l1_b"],
                             p["l1_bn"]), 0.0)
    num_feat = jnp.maximum(bn_apply(n @ p["l2_w"] + p["l2_b"], p["l2_bn"]), 0.0)
    x = jnp.concatenate([img_feat, num_feat], axis=1)
    x = jnp.maximum(bn_apply(x @ p["f1_w"] + p["f1_b"], p["f1_bn"]), 0.0)
    x = x @ p["f2_w"] + p["f2_b"]
    return jnp.squeeze(x)


# ----------------------------------------------------------------------------
if __name__ == "__main__":
    B, H, W = 2, 16, 16
    C_IMG = 4   # len(args.img_keys)
    K_NUM = 6   # len(args.num_keys)

    key = jax.random.PRNGKey(0)
    k_img, k_num, k_par = jax.random.split(key, 3)

    img = jax.random.normal(k_img, (B, H, W, C_IMG), jnp.float32)   # NHWC input
    num = jax.random.normal(k_num, (B, K_NUM), jnp.float32)
    params = init_params(k_par, C_IMG, K_NUM)

    prep = prepare_params(params, batch=B, height=H, width=W,
                          c_img=C_IMG, k_num=K_NUM)     # one-time, off hot path
    fwd = build_forward(prep["cfg"])

    out = jax.block_until_ready(
        fwd(prep["w128"], prep["wwide"], prep["cst"], img, num))
    assert out.shape == (B,), out.shape

    ref = jax.block_until_ready(net_forward_reference(params, img, num))
    np.testing.assert_allclose(np.asarray(out), np.asarray(ref),
                               rtol=3e-2, atol=3e-2)   # bf16 matmul operands
    print("KERNEL_OK")
</pallas_src>

<mosaic_0001>
module attributes {stable_mosaic.version = 11 : i64} {
  func.func @kernel(%arg0: memref<32x64xf32, #tpu.memory_space<vmem>>, %arg1: memref<2x6xf32, #tpu.memory_space<vmem>>, %arg2: memref<1360x128xbf16, #tpu.memory_space<vmem>>, %arg3: memref<384x512xbf16, #tpu.memory_space<vmem>>, %arg4: memref<112x512xf32, #tpu.memory_space<vmem>>, %arg5: memref<2x128xf32, #tpu.memory_space<vmem>>) attributes {dimension_semantics = [], scalar_prefetch = 0 : i64, scratch_operands = 0 : i64, tpu.core_type = #tpu.core_type<tc>} {
    %c0 = arith.constant 0 : index
    %c0_0 = arith.constant 0 : index
    %0 = vector.load %arg0[%c0, %c0_0] : memref<32x64xf32, #tpu.memory_space<vmem>>, vector<32x64xf32>
    %1 = arith.truncf %0 : vector<32x64xf32> to vector<32x64xbf16>
    %cst = arith.constant 0.000000e+00 : f32
    %2 = vector.broadcast %cst : f32 to vector<16x128xf32>
    %c56 = arith.constant 56 : index
    %c0_1 = arith.constant 0 : index
    %3 = vector.load %arg4[%c56, %c0_1] : memref<112x512xf32, #tpu.memory_space<vmem>>, vector<16x32xf32>
    %4 = arith.truncf %3 : vector<16x32xf32> to vector<16x32xbf16>
    %cst_2 = arith.constant dense<0.000000e+00> : vector<16x64xf32>
    %5 = tpu.matmul %4, %1, %cst_2 {dimension_numbers = #tpu.dot_dimension_numbers<[1], [0], [0], [1], [0, 0, 1, 1], [], []>} : vector<16x32xbf16>, vector<32x64xbf16>, vector<16x64xf32> -> vector<16x64xf32>
    %6 = arith.truncf %5 : vector<16x64xf32> to vector<16x64xbf16>
    %c0_3 = arith.constant 0 : index
    %c0_4 = arith.constant 0 : index
    %7 = vector.load %arg2[%c0_3, %c0_4] : memref<1360x128xbf16, #tpu.memory_space<vmem>>, vector<64x128xbf16>
    %cst_5 = arith.constant dense<0.000000e+00> : vector<16x128xf32>
    %8 = tpu.matmul %6, %7, %cst_5 {dimension_numbers = #tpu.dot_dimension_numbers<[1], [0], [0], [1], [0, 0, 1, 1], [], []>} : vector<16x64xbf16>, vector<64x128xbf16>, vector<16x128xf32> -> vector<16x128xf32>
    %9 = arith.addf %2, %8 : vector<16x128xf32>
    %c72 = arith.constant 72 : index
    %c0_6 = arith.constant 0 : index
    %10 = vector.load %arg4[%c72, %c0_6] : memref<112x512xf32, #tpu.memory_space<vmem>>, vector<16x32xf32>
    %11 = arith.truncf %10 : vector<16x32xf32> to vector<16x32xbf16>
    %cst_7 = arith.constant dense<0.000000e+00> : vector<16x64xf32>
    %12 = tpu.matmul %11, %1, %cst_7 {dimension_numbers = #tpu.dot_dimension_numbers<[1], [0], [0], [1], [0, 0, 1, 1], [], []>} : vector<16x32xbf16>, vector<32x64xbf16>, vector<16x64xf32> -> vector<16x64xf32>
    %13 = arith.truncf %12 : vector<16x64xf32> to vector<16x64xbf16>
    %c64 = arith.constant 64 : index
    %c0_8 = arith.constant 0 : index
    %14 = vector.load %arg2[%c64, %c0_8] : memref<1360x128xbf16, #tpu.memory_space<vmem>>, vector<64x128xbf16>
    %cst_9 = arith.constant dense<0.000000e+00> : vector<16x128xf32>
    %15 = tpu.matmul %13, %14, %cst_9 {dimension_numbers = #tpu.dot_dimension_numbers<[1], [0], [0], [1], [0, 0, 1, 1], [], []>} : vector<16x64xbf16>, vector<64x128xbf16>, vector<16x128xf32> -> vector<16x128xf32>
    %16 = arith.addf %9, %15 : vector<16x128xf32>
    %c88 = arith.constant 88 : index
    %c0_10 = arith.constant 0 : index
    %17 = vector.load %arg4[%c88, %c0_10] : memref<112x512xf32, #tpu.memory_space<vmem>>, vector<16x32xf32>
    %18 = arith.truncf %17 : vector<16x32xf32> to vector<16x32xbf16>
    %cst_11 = arith.constant dense<0.000000e+00> : vector<16x64xf32>
    %19 = tpu.matmul %18, %1, %cst_11 {dimension_numbers = #tpu.dot_dimension_numbers<[1], [0], [0], [1], [0, 0, 1, 1], [], []>} : vector<16x32xbf16>, vector<32x64xbf16>, vector<16x64xf32> -> vector<16x64xf32>
    %20 = arith.truncf %19 : vector<16x64xf32> to vector<16x64xbf16>
    %c128 = arith.constant 128 : index
    %c0_12 = arith.constant 0 : index
    %21 = vector.load %arg2[%c128, %c0_12] : memref<1360x128xbf16, #tpu.memory_space<vmem>>, vector<64x128xbf16>
    %cst_13 = arith.constant dense<0.000000e+00> : vector<16x128xf32>
    %22 = tpu.matmul %20, %21, %cst_13 {dimension_numbers = #tpu.dot_dimension_numbers<[1], [0], [0], [1], [0, 0, 1, 1], [], []>} : vector<16x64xbf16>, vector<64x128xbf16>, vector<16x128xf32> -> vector<16x128xf32>
    %23 = arith.addf %16, %22 : vector<16x128xf32>
    %c0_14 = arith.constant 0 : index
    %c0_15 = arith.constant 0 : index
    %24 = vector.load %arg4[%c0_14, %c0_15] : memref<112x512xf32, #tpu.memory_space<vmem>>, vector<1x128xf32>
    %25 = vector.broadcast %24 : vector<1x128xf32> to vector<16x128xf32>
    %26 = arith.addf %23, %25 : vector<16x128xf32>
    %cst_16 = arith.constant 3.000000e+00 : f32
    %27 = vector.broadcast %cst_16 : f32 to vector<16x128xf32>
    %28 = arith.addf %26, %27 : vector<16x128xf32>
    %cst_17 = arith.constant 0.000000e+00 : f32
    %cst_18 = arith.constant 6.000000e+00 : f32
    %29 = vector.broadcast %cst_17 : f32 to vector<16x128xf32>
    %30 = arith.maximumf %29, %28 : vector<16x128xf32>
    %31 = vector.broadcast %cst_18 : f32 to vector<16x128xf32>
    %32 = arith.minimumf %31, %30 : vector<16x128xf32>
    %33 = arith.mulf %26, %32 : vector<16x128xf32>
    %cst_19 = arith.constant 0.166666672 : f32
    %34 = vector.broadcast %cst_19 : f32 to vector<16x128xf32>
    %35 = arith.mulf %33, %34 : vector<16x128xf32>
    %36 = arith.truncf %35 : vector<16x128xf32> to vector<16x128xbf16>
    %c0_20 = arith.constant 0 : index
    %c0_21 = arith.constant 0 : index
    %37 = vector.load %arg3[%c0_20, %c0_21] : memref<384x512xbf16, #tpu.memory_space<vmem>>, vector<128x512xbf16>
    %cst_22 = arith.constant dense<0.000000e+00> : vector<16x512xf32>
    %38 = tpu.matmul %36, %37, %cst_22 {dimension_numbers = #tpu.dot_dimension_numbers<[1], [0], [0], [1], [0, 0, 1, 1], [], []>} : vector<16x128xbf16>, vector<128x512xbf16>, vector<16x512xf32> -> vector<16x512xf32>
    %c8 = arith.constant 8 : index
    %c0_23 = arith.constant 0 : index
    %39 = vector.load %arg4[%c8, %c0_23] : memref<112x512xf32, #tpu.memory_space<vmem>>, vector<1x512xf32>
    %40 = vector.broadcast %39 : vector<1x512xf32> to vector<16x512xf32>
    %41 = arith.addf %38, %40 : vector<16x512xf32>
    %cst_24 = arith.constant 3.000000e+00 : f32
    %42 = vector.broadcast %cst_24 : f32 to vector<16x512xf32>
    %43 = arith.addf %41, %42 : vector<16x512xf32>
    %cst_25 = arith.constant 0.000000e+00 : f32
    %cst_26 = arith.constant 6.000000e+00 : f32
    %44 = vector.broadcast %cst_25 : f32 to vector<16x512xf32>
    %45 = arith.maximumf %44, %43 : vector<16x512xf32>
    %46 = vector.broadcast %cst_26 : f32 to vector<16x512xf32>
    %47 = arith.minimumf %46, %45 : vector<16x512xf32>
    %48 = arith.mulf %41, %47 : vector<16x512xf32>
    %cst_27 = arith.constant 0.166666672 : f32
    %49 = vector.broadcast %cst_27 : f32 to vector<16x512xf32>
    %50 = arith.mulf %48, %49 : vector<16x512xf32>
    %51 = arith.truncf %50 : vector<16x512xf32> to vector<16x512xbf16>
    %c192 = arith.constant 192 : index
    %c0_28 = arith.constant 0 : index
    %52 = vector.load %arg2[%c192, %c0_28] : memref<1360x128xbf16, #tpu.memory_space<vmem>>, vector<512x128xbf16>
    %cst_29 = arith.constant dense<0.000000e+00> : vector<16x128xf32>
    %53 = tpu.matmul %51, %52, %cst_29 {dimension_numbers = #tpu.dot_dimension_numbers<[1], [0], [0], [1], [0, 0, 1, 1], [], []>} : vector<16x512xbf16>, vector<512x128xbf16>, vector<16x128xf32> -> vector<16x128xf32>
    %c104 = arith.constant 104 : index
    %c0_30 = arith.constant 0 : index
    %54 = vector.load %arg4[%c104, %c0_30] : memref<112x512xf32, #tpu.memory_space<vmem>>, vector<2x16xf32>
    %55 = arith.truncf %54 : vector<2x16xf32> to vector<2x16xbf16>
    %56 = arith.truncf %53 : vector<16x128xf32> to vector<16x128xbf16>
    %cst_31 = arith.constant dense<0.000000e+00> : vector<2x128xf32>
    %57 = tpu.matmul %55, %56, %cst_31 {dimension_numbers = #tpu.dot_dimension_numbers<[1], [0], [0], [1], [0, 0, 1, 1], [], []>} : vector<2x16xbf16>, vector<16x128xbf16>, vector<2x128xf32> -> vector<2x128xf32>
    %c16 = arith.constant 16 : index
    %c0_32 = arith.constant 0 : index
    %58 = vector.load %arg4[%c16, %c0_32] : memref<112x512xf32, #tpu.memory_space<vmem>>, vector<1x128xf32>
    %59 = vector.broadcast %58 : vector<1x128xf32> to vector<2x128xf32>
    %60 = arith.addf %57, %59 : vector<2x128xf32>
    %cst_33 = arith.constant 3.000000e+00 : f32
    %61 = vector.broadcast %cst_33 : f32 to vector<2x128xf32>
    %62 = arith.addf %60, %61 : vector<2x128xf32>
    %cst_34 = arith.constant 0.000000e+00 : f32
    %cst_35 = arith.constant 6.000000e+00 : f32
    %63 = vector.broadcast %cst_34 : f32 to vector<2x128xf32>
    %64 = arith.maximumf %63, %62 : vector<2x128xf32>
    %65 = vector.broadcast %cst_35 : f32 to vector<2x128xf32>
    %66 = arith.minimumf %65, %64 : vector<2x128xf32>
    %67 = arith.mulf %60, %66 : vector<2x128xf32>
    %cst_36 = arith.constant 0.166666672 : f32
    %68 = vector.broadcast %cst_36 : f32 to vector<2x128xf32>
    %69 = arith.mulf %67, %68 : vector<2x128xf32>
    %c0_37 = arith.constant 0 : index
    %c0_38 = arith.constant 0 : index
    %70 = vector.load %arg1[%c0_37, %c0_38] : memref<2x6xf32, #tpu.memory_space<vmem>>, vector<2x6xf32>
    %71 = arith.truncf %70 : vector<2x6xf32> to vector<2x6xbf16>
    %c832 = arith.constant 832 : index
    %c0_39 = arith.constant 0 : index
    %72 = vector.load %arg2[%c832, %c0_39] : memref<1360x128xbf16, #tpu.memory_space<vmem>>, vector<6x128xbf16>
    %cst_40 = arith.constant dense<0.000000e+00> : vector<2x128xf32>
    %73 = tpu.matmul %71, %72, %cst_40 {dimension_numbers = #tpu.dot_dimension_numbers<[1], [0], [0], [1], [0, 0, 1, 1], [], []>} : vector<2x6xbf16>, vector<6x128xbf16>, vector<2x128xf32> -> vector<2x128xf32>
    %c24 = arith.constant 24 : index
    %c0_41 = arith.constant 0 : index
    %74 = vector.load %arg4[%c24, %c0_41] : memref<112x512xf32, #tpu.memory_space<vmem>>, vector<1x128xf32>
    %75 = vector.broadcast %74 : vector<1x128xf32> to vector<2x128xf32>
    %76 = arith.addf %73, %75 : vector<2x128xf32>
    %cst_42 = arith.constant 0.000000e+00 : f32
    %77 = vector.broadcast %cst_42 : f32 to vector<2x128xf32>
    %78 = arith.maximumf %76, %77 : vector<2x128xf32>
    %79 = arith.truncf %78 : vector<2x128xf32> to vector<2x128xbf16>
    %c704 = arith.constant 704 : index
    %c0_43 = arith.constant 0 : index
    %80 = vector.load %arg2[%c704, %c0_43] : memref<1360x128xbf16, #tpu.memory_space<vmem>>, vector<128x128xbf16>
    %cst_44 = arith.constant dense<0.000000e+00> : vector<2x128xf32>
    %81 = tpu.matmul %79, %80, %cst_44 {dimension_numbers = #tpu.dot_dimension_numbers<[1], [0], [0], [1], [0, 0, 1, 1], [], []>} : vector<2x128xbf16>, vector<128x128xbf16>, vector<2x128xf32> -> vector<2x128xf32>
    %c32 = arith.constant 32 : index
    %c0_45 = arith.constant 0 : index
    %82 = vector.load %arg4[%c32, %c0_45] : memref<112x512xf32, #tpu.memory_space<vmem>>, vector<1x128xf32>
    %83 = vector.broadcast %82 : vector<1x128xf32> to vector<2x128xf32>
    %84 = arith.addf %81, %83 : vector<2x128xf32>
    %cst_46 = arith.constant 0.000000e+00 : f32
    %85 = vector.broadcast %cst_46 : f32 to vector<2x128xf32>
    %86 = arith.maximumf %84, %85 : vector<2x128xf32>
    %87 = arith.truncf %69 : vector<2x128xf32> to vector<2x128xbf16>
    %c128_47 = arith.constant 128 : index
    %c0_48 = arith.constant 0 : index
    %88 = vector.load %arg3[%c128_47, %c0_48] : memref<384x512xbf16, #tpu.memory_space<vmem>>, vector<128x512xbf16>
    %cst_49 = arith.constant dense<0.000000e+00> : vector<2x512xf32>
    %89 = tpu.matmul %87, %88, %cst_49 {dimension_numbers = #tpu.dot_dimension_numbers<[1], [0], [0], [1], [0, 0, 1, 1], [], []>} : vector<2x128xbf16>, vector<128x512xbf16>, vector<2x512xf32> -> vector<2x512xf32>
    %90 = arith.truncf %86 : vector<2x128xf32> to vector<2x128xbf16>
    %c256 = arith.constant 256 : index
    %c0_50 = arith.constant 0 : index
    %91 = vector.load %arg3[%c256, %c0_50] : memref<384x512xbf16, #tpu.memory_space<vmem>>, vector<128x512xbf16>
    %cst_51 = arith.constant dense<0.000000e+00> : vector<2x512xf32>
    %92 = tpu.matmul %90, %91, %cst_51 {dimension_numbers = #tpu.dot_dimension_numbers<[1], [0], [0], [1], [0, 0, 1, 1], [], []>} : vector<2x128xbf16>, vector<128x512xbf16>, vector<2x512xf32> -> vector<2x512xf32>
    %93 = arith.addf %89, %92 : vector<2x512xf32>
    %c40 = arith.constant 40 : index
    %c0_52 = arith.constant 0 : index
    %94 = vector.load %arg4[%c40, %c0_52] : memref<112x512xf32, #tpu.memory_space<vmem>>, vector<1x512xf32>
    %95 = vector.broadcast %94 : vector<1x512xf32> to vector<2x512xf32>
    %96 = arith.addf %93, %95 : vector<2x512xf32>
    %cst_53 = arith.constant 0.000000e+00 : f32
    %97 = vector.broadcast %cst_53 : f32 to vector<2x512xf32>
    %98 = arith.maximumf %96, %97 : vector<2x512xf32>
    %99 = arith.truncf %98 : vector<2x512xf32> to vector<2x512xbf16>
    %c848 = arith.constant 848 : index
    %c0_54 = arith.constant 0 : index
    %100 = vector.load %arg2[%c848, %c0_54] : memref<1360x128xbf16, #tpu.memory_space<vmem>>, vector<512x128xbf16>
    %cst_55 = arith.constant dense<0.000000e+00> : vector<2x128xf32>
    %101 = tpu.matmul %99, %100, %cst_55 {dimension_numbers = #tpu.dot_dimension_numbers<[1], [0], [0], [1], [0, 0, 1, 1], [], []>} : vector<2x512xbf16>, vector<512x128xbf16>, vector<2x128xf32> -> vector<2x128xf32>
    %c48 = arith.constant 48 : index
    %c0_56 = arith.constant 0 : index
    %102 = vector.load %arg4[%c48, %c0_56] : memref<112x512xf32, #tpu.memory_space<vmem>>, vector<1x128xf32>
    %103 = vector.broadcast %102 : vector<1x128xf32> to vector<2x128xf32>
    %104 = arith.addf %101, %103 : vector<2x128xf32>
    %c0_57 = arith.constant 0 : index
    %c0_58 = arith.constant 0 : index
    %105 = vector.load %arg5[%c0_57, %c0_58] : memref<2x128xf32, #tpu.memory_space<vmem>>, vector<2x128xf32>
    tpu.vector_store %arg5[%c0_57, %c0_58], %104 {strides = array<i32>} : memref<2x128xf32, #tpu.memory_space<vmem>>, vector<2x128xf32>,
    return
  }
}

</mosaic_0001>

<bundles_post_ra>
// kernel: forward.1
= control target key start
LH: loop header
LB: loop body
LE: loop exit
PB: predicated region body
PF: predicated region fallthrough
CT: control target
= control target key end

     0   :  { %10 = vsyncpa [#allocation3], 0  ;;  %s3174_s0 = inlined_call_operand.vmem [shape: f32[32,64], index: 0, kind: input, shape index: {}]   ;;  %s3175_s1 = inlined_call_operand.vmem [shape: f32[2,6], index: 1, kind: input, shape index: {}]   ;;  %s3176_s2 = inlined_call_operand.hbm [shape: bf16[1360,128], index: 2, kind: input, shape index: {}]   ;;  %s3177_s3 = inlined_call_operand.hbm [shape: bf16[384,512], index: 3, kind: input, shape index: {}]   ;;  %s3178_s4 = inlined_call_operand.vmem [shape: f32[112,512], index: 4, kind: input, shape index: {}]   ;;  %s3179_s5 = inlined_call_operand.vmem [shape: f32[2,128], index: 5, kind: output, shape index: {}]  }
   0x1   :  { %11 = vsyncpa [#allocation5], 0  ;;  %s2962_s18 = smov [#allocation2]   ;;  %s2914_s22 = scalar_lea.hbm %s3176_s2, 10880 }
   0x2   :  { %s21_s19 = sshll.u32 %s2962_s18, 4  ;;  %p2915_p0 = scmp.ne.s32.totalorder %s3176_s2, %s2914_s22  ;;  %s22_s19 = int_to_ptr.vmem [resolvable:$true] %s21_s19 }
   0x3   :  { %p2918_p1 = scmp.lt.u32.totalorder %s2914_s22, %s3176_s2 }
   0x5   :  { %p2920_p2 = pnand %p2918_p1, %p2915_p0 }
   0x7   :  { %2923 = shalt.err (!%p2920_p2)
}
   0x8   :  { %s2924_s27 = scalar_lea.vmem %s22_s19, 10880  ;;  %p2929_p4 = scmp.lt.s32.totalorder %s22_s19, %s22_s19 }
   0x9   :  { %p2925_p3 = scmp.ne.s32.totalorder %s22_s19, %s2924_s27  ;;  %p2930_p5 = scmp.lt.s32.totalorder %s2924_s27, %s2924_s27 }
   0xb   :  { %p2931_p6 = por %p2930_p5, %p2929_p4 }
   0xd   :  { %p2932_p7 = pnand %p2931_p6, %p2925_p3 }
   0xf   :  { %2935 = shalt.err (!%p2932_p7)
}
  0x10   :  { %s2963_s28 = smov 64   ;;  %s2964_s29 = smov 4  }
  0x11   :  { %27 = dma.hbm_to_vmem [thread:$0]  %s3176_s2, 10880, %s22_s19, [#allocation3], %s2963_s28, %s2963_s28, %s2964_s29  }
  0x12   :  { %s2965_s7 = smov [#allocation4]   ;;  %s2936_s11 = scalar_lea.hbm %s3177_s3, 12288 }
  0x13   :  { %s33_s8 = sshll.u32 %s2965_s7, 4  ;;  %p2937_p8 = scmp.ne.s32.totalorder %s3177_s3, %s2936_s11  ;;  %s34_s8 = int_to_ptr.vmem [resolvable:$true] %s33_s8 }
  0x14   :  { %p2940_p9 = scmp.lt.u32.totalorder %s2936_s11, %s3177_s3 }
  0x16   :  { %p2942_p10 = pnand %p2940_p9, %p2937_p8 }
  0x18   :  { %2945 = shalt.err (!%p2942_p10)
}
  0x19   :  { %s2946_s16 = scalar_lea.vmem %s34_s8, 12288  ;;  %p2951_p12 = scmp.lt.s32.totalorder %s34_s8, %s34_s8 }
  0x1a   :  { %p2947_p11 = scmp.ne.s32.totalorder %s34_s8, %s2946_s16  ;;  %p2952_p13 = scmp.lt.s32.totalorder %s2946_s16, %s2946_s16 }
  0x1c   :  { %p2953_p0 = por %p2952_p13, %p2951_p12 }
  0x1e   :  { %p2954_p1 = pnand %p2953_p0, %p2947_p11 }
  0x20   :  { %2957 = shalt.err (!%p2954_p1)
}
  0x21   :  { %s2966_s2 = smov 256   ;;  %s2967_s17 = smov 16  }
  0x22   :  { %39 = dma.hbm_to_vmem [thread:$0]  %s3177_s3, 12288, %s34_s8, [#allocation5], %s2966_s2, %s2966_s2, %s2967_s17  }
  0x23   :  { %2958 = dma.done.wait [#allocation3], 10880  }
  0x24   :  { %2959 = vsyncadd [#allocation3], 4294956416 }
  0x25   :  { %2960 = dma.done.wait [#allocation5], 12288  }
  0x26   :  { %2961 = vsyncadd [#allocation5], 4294955008  ;;  %v2968_v0 = vmov 0.0   ;;  %vm2969_vm0 = vmmov 0   ;;  %v49_v1 = vld [vmem:[%s3174_s0] sm:$0xff]  ;;  %v50_v2 = vld [vmem:[%s3174_s0 + $0x8] sm:$0xff] }
  0x27   :  { %2585 = vmatprep.subr.bf16.mxu0 %v2968_v0  ;;  %2589 = vmatprep.mubr.msk.bf16.mxu0 %vm2969_vm0, %v2968_v0  ;;  %v51_v3 = vld [vmem:[%s3174_s0 + $0x10] sm:$0xff]  ;;  %v53_v4 = vpack.c.bf16 %v50_v2, %v49_v1  ;;  %v52_v5 = vld [vmem:[%s3174_s0 + $0x18] sm:$0xff]  ;;  %v55_v6 = vld [vmem:[%s3178_s4 + $0xe0] sm:$0xff]  ;;  %vm58_vm1 = vcmask 261120   ;;  %vm192_vm2 = vcmask 523264   ;;  %vm1189_vm3 = vcmask 1042432  }
  0x28   :  { %2613 = vmatprep.subr.bf16.mxu1 %v2968_v0  ;;  %2621 = vmatprep.mubr.msk.bf16.mxu1 %vm2969_vm0, %v2968_v0  ;;  %v56_v7 = vld [vmem:[%s3178_s4 + $0x100] sm:$0xff]  ;;  %v54_v8 = vpack.c.bf16 %v52_v5, %v51_v3  ;;  %v2687_v10 = vld [vmem:[#allocation2 + $0x8] sm:$0xff]   ;;  %v2689_v12 = vld [vmem:[#allocation2 + $0x10] sm:$0xff]   ;;  %vm1132_vm4 = vcmask 130048   ;;  %vm1185_vm5 = vcmask 48128  }
  0x29   :  { %2586 = vmatpush3.bf16.msra.mxu0 %v53_v4  ;;  %v2686_v9 = vld [vmem:[#allocation2] sm:$0xff]   ;;  %v57_v11 = vpack.c.bf16 %v56_v7, %v55_v6  ;;  %v2690_v17 = vld [vmem:[#allocation2 + $0x28] sm:$0xff]   ;;  %v2691_v18 = vld [vmem:[#allocation2 + $0x18] sm:$0xff]  }
  0x2a   :  { %2587 = vmatprep.subr.bf16.mxu0 %v2968_v0  ;;  %2614 = vmatpush3.bf16.msra.mxu1 %v2686_v9  ;;  %v112_v13 = vld [vmem:[%s3178_s4 + $0x120] sm:$0xff]  ;;  %v2692_v19 = vld [vmem:[#allocation2 + $0x30] sm:$0xff]   ;;  %v2693_v20 = vld [vmem:[#allocation2 + $0x38] sm:$0xff]  }
  0x2b   :  { %2615 = vmatprep.subr.bf16.mxu1 %v2968_v0  ;;  %v113_v14 = vld [vmem:[%s3178_s4 + $0x140] sm:$0xff]  ;;  %v2695_v35 = vld [vmem:[#allocation2 + $0x48] sm:$0xff]   ;;  %v2696_v36 = vld [vmem:[#allocation2 + $0x50] sm:$0xff]  }
  0x2c   :  { %v2688_v15 = vld [vmem:[#allocation2 + $0x20] sm:$0xff]   ;;  %v114_v16 = vpack.c.bf16 %v113_v14, %v112_v13  ;;  %v2697_v37 = vld [vmem:[#allocation2 + $0x58] sm:$0xff]  }
  0x2d   :  { %2588 = vmatpush3.bf16.msra.mxu0 %v54_v8  ;;  %v305_v31 = vld [vmem:[%s3178_s4 + $0x160] sm:$0xff]  ;;  %v2698_v38 = vld [vmem:[#allocation4] ss:$16 sps:$4 sm:$0xff]   ;;  %v2700_v39 = vld [vmem:[#allocation4 + $0x4] ss:$16 sps:$4 sm:$0xff]  }
  0x2e   :  { %2593 = vmatprep.subr.bf16.mxu0 %v2968_v0  ;;  %2616 = vmatpush3.bf16.msra.mxu1 %v2687_v10  ;;  %v306_v32 = vld [vmem:[%s3178_s4 + $0x180] sm:$0xff]  ;;  %v2706_v41 = vld [vmem:[#allocation4 + $0x24] ss:$16 sps:$4 sm:$0xff]   ;;  %v2704_v42 = vld [vmem:[#allocation4 + $0x20] ss:$16 sps:$4 sm:$0xff]  }
  0x2f   :  { %2617 = vmatprep.subr.bf16.mxu1 %v2968_v0  ;;  %v307_v33 = vpack.c.bf16 %v306_v32, %v305_v31  ;;  %v2694_v34 = vld [vmem:[#allocation2 + $0x40] sm:$0xff]   ;;  %v2712_v43 = vld [vmem:[#allocation4 + $0x44] ss:$16 sps:$4 sm:$0xff]   ;;  %v2710_v44 = vld [vmem:[#allocation4 + $0x40] ss:$16 sps:$4 sm:$0xff]  }
  0x30   :  { %2590 = vmatmul.mubr.msk.bf16.vlgmr.msra.gmra.mrb[0].mxu0 %vm58_vm1, %v57_v11  ;;  %v2703_v40 = vld [vmem:[#allocation4 + $0xc] ss:$16 sps:$4 sm:$0xff]   ;;  %v2718_v45 = vld [vmem:[#allocation4 + $0x64] ss:$16 sps:$4 sm:$0xff]   ;;  %v2716_v46 = vld [vmem:[#allocation4 + $0x60] ss:$16 sps:$4 sm:$0xff]  }
  0x31   :  { %2594 = vmatpush3.bf16.msra.mxu0 %v53_v4  ;;  %2597 = vmatprep.mubr.msk.bf16.mxu0 %vm2969_vm0, %v2968_v0  ;;  %v2701_v60 = vld [vmem:[#allocation4 + $0x8] ss:$16 sps:$4 sm:$0xff]   ;;  %v2709_v63 = vld [vmem:[#allocation4 + $0x2c] ss:$16 sps:$4 sm:$0xff]   ;;  %v2724_v6 = vld [vmem:[#allocation4 + $0x84] ss:$16 sps:$4 sm:$0xff]  }
  0x32   :  { %2595 = vmatprep.subr.bf16.mxu0 %v2968_v0  ;;  %2618 = vmatpush3.bf16.msra.mxu1 %v2689_v12  ;;  %v2707_v1 = vld [vmem:[#allocation4 + $0x28] ss:$16 sps:$4 sm:$0xff]   ;;  %v2715_v2 = vld [vmem:[#allocation4 + $0x4c] ss:$16 sps:$4 sm:$0xff]   ;;  %v2730_v10 = vld [vmem:[#allocation4 + $0xa4] ss:$16 sps:$4 sm:$0xff]  }
  0x33   :  { %2619 = vmatprep.subr.bf16.mxu1 %v2968_v0  ;;  %v2713_v3 = vld [vmem:[#allocation4 + $0x48] ss:$16 sps:$4 sm:$0xff]   ;;  %v2727_v7 = vld [vmem:[#allocation4 + $0x8c] ss:$16 sps:$4 sm:$0xff]   ;;  %v2728_v12 = vld [vmem:[#allocation4 + $0xa0] ss:$16 sps:$4 sm:$0xff]  }
  0x34   :  { %v2719_v5 = vld [vmem:[#allocation4 + $0x68] ss:$16 sps:$4 sm:$0xff]   ;;  %v2733_v11 = vld [vmem:[#allocation4 + $0xac] ss:$16 sps:$4 sm:$0xff]   ;;  %v2736_v14 = vld [vmem:[#allocation4 + $0xc4] ss:$16 sps:$4 sm:$0xff]  }
  0x35   :  { %2596 = vmatpush3.bf16.msra.mxu0 %v54_v8  ;;  %v2725_v9 = vld [vmem:[#allocation4 + $0x88] ss:$16 sps:$4 sm:$0xff]  }
  0x36   :  { %2601 = vmatprep.subr.bf16.mxu0 %v2968_v0  ;;  %2620 = vmatpush3.bf16.msra.mxu1 %v2691_v18  ;;  %v2731_v13 = vld [vmem:[#allocation4 + $0xa8] ss:$16 sps:$4 sm:$0xff]   ;;  %v2742_v18 = vld [vmem:[#allocation4 + $0xe4] ss:$16 sps:$4 sm:$0xff]  }
  0x37   :  { %2633 = vmatprep.subr.bf16.mxu1 %v2968_v0 }
  0x38   :  { %2598 = vmatmul.mubr.msk.bf16.vlgmr.msra.gmra.mrb[4].mxu0 %vm58_vm1, %v114_v16  ;;  %v2734_v16 = vld [vmem:[#allocation4 + $0xc0] ss:$16 sps:$4 sm:$0xff]  }
  0x39   :  { %2602 = vmatpush3.bf16.msra.mxu0 %v2688_v15  ;;  %2609 = vmatprep.mubr.msk.bf16.mxu0 %vm2969_vm0, %v2968_v0  ;;  %v2739_v15 = vld [vmem:[#allocation4 + $0xcc] ss:$16 sps:$4 sm:$0xff]  }
  0x3a   :  { %2603 = vmatprep.subr.bf16.mxu0 %v2968_v0 }
  0x3d   :  { %2604 = vmatpush3.bf16.msra.mxu0 %v2690_v17  ;;  %v2737_v17 = vld [vmem:[#allocation4 + $0xc8] ss:$16 sps:$4 sm:$0xff]  }
  0x3e   :  { %2605 = vmatprep.subr.bf16.mxu0 %v2968_v0 }
  0x41   :  { %2606 = vmatpush3.bf16.msra.mxu0 %v2692_v19  ;;  %v2745_v19 = vld [vmem:[#allocation4 + $0xec] ss:$16 sps:$4 sm:$0xff]  }
  0x42   :  { %2607 = vmatprep.subr.bf16.mxu0 %v2968_v0 }
  0x45   :  { %2608 = vmatpush3.bf16.msra.mxu0 %v2693_v20  ;;  %v2740_v20 = vld [vmem:[#allocation4 + $0xe0] ss:$16 sps:$4 sm:$0xff]  }
  0x46   :  { %2625 = vmatprep.subr.bf16.mxu0 %v2968_v0 }
 0x103   :  { %v96_v21 = vpop.f32.mrb[0].mxu0 }
 0x104   :  { %v2591_v22 = vpop.f32.mrb[1].mxu0 }
 0x105   :  { %v99_v23 = vpop.f32.mrb[2].mxu0  ;;  %v2970_v22 = vmov 0  }
 0x106   :  { %v103_v24 = vpack.c.bf16 %v99_v23, %v96_v21  ;;  %v2592_v25 = vpop.f32.mrb[3].mxu0  ;;  %v2743_v21 = vld [vmem:[#allocation4 + $0xe8] ss:$16 sps:$4 sm:$0xff]  }
 0x107   :  { %v2746_v23 = vld [vmem:[#allocation2 + $0xa0] sm:$0xff]  }
 0x108   :  { %2622 = vmatmul.mubr.msk.bf16.vlgmr.msra.gmra.mrb[0].mxu1 %vm192_vm2, %v103_v24  ;;  %v2747_v24 = vld [vmem:[#allocation2 + $0x120] sm:$0xff]  }
 0x109   :  { %2641 = vmatprep.mubr.msk.bf16.mxu1 %vm2969_vm0, %v2968_v0  ;;  %2634 = vmatpush3.bf16.msra.mxu1 %v2694_v34 }
 0x10a   :  { %2635 = vmatprep.subr.bf16.mxu1 %v2968_v0 }
 0x10b   :  { %v152_v26 = vpop.f32.mrb[4].mxu0 }
 0x10c   :  { %v2599_v27 = vpop.f32.mrb[5].mxu0 }
 0x10d   :  { %v155_v28 = vpop.f32.mrb[6].mxu0  ;;  %2636 = vmatpush3.bf16.msra.mxu1 %v2695_v35 }
 0x10e   :  { %v159_v29 = vpack.c.bf16 %v155_v28, %v152_v26  ;;  %v2600_v30 = vpop.f32.mrb[7].mxu0  ;;  %2637 = vmatprep.subr.bf16.mxu1 %v2968_v0  ;;  %v431_v26 = vld [vmem:[%s3178_s4] ss:$0 sm:$0xff] }
 0x110   :  { %2610 = vmatmul.mubr.msk.bf16.vlgmr.msra.gmra.mrb[8].mxu0 %vm192_vm2, %v159_v29 }
 0x111   :  { %2626 = vmatpush3.bf16.msra.mxu0 %v53_v4  ;;  %2629 = vmatprep.mubr.msk.bf16.mxu0 %vm2969_vm0, %v2968_v0  ;;  %v2721_v4 = vld [vmem:[#allocation4 + $0x6c] ss:$16 sps:$4 sm:$0xff]  }
 0x112   :  { %2627 = vmatprep.subr.bf16.mxu0 %v2968_v0  ;;  %2638 = vmatpush3.bf16.msra.mxu1 %v2696_v36 }
 0x113   :  { %2639 = vmatprep.subr.bf16.mxu1 %v2968_v0 }
 0x115   :  { %2628 = vmatpush3.bf16.msra.mxu0 %v54_v8  ;;  %v2722_v8 = vld [vmem:[#allocation4 + $0x80] ss:$16 sps:$4 sm:$0xff]  }
 0x116   :  { %2640 = vmatpush3.bf16.msra.mxu1 %v2697_v37  ;;  %660 = vmatprep.subr.bf16.mxu0 %v2700_v39 }
 0x117   :  { %703 = vmatprep.subr.bf16.mxu1 %v2703_v40 }
 0x118   :  { %2630 = vmatmul.mubr.msk.bf16.vlgmr.msra.gmra.mrb[12].mxu0 %vm58_vm1, %v307_v33 }
 0x119   :  { %661 = vmatpush1.bf16.msra.mxu0 %v2698_v38  ;;  %692 = vmatprep.mubr.bf16.mxu0 %v2970_v22 }
 0x11a   :  { %662 = vmatprep.subr.bf16.mxu0 %v2706_v41 }
 0x11d   :  { %663 = vmatpush1.bf16.msra.mxu0 %v2704_v42 }
 0x11e   :  { %664 = vmatprep.subr.bf16.mxu0 %v2712_v43 }
 0x121   :  { %665 = vmatpush1.bf16.msra.mxu0 %v2710_v44  ;;  %v2748_v44 = vld [vmem:[#allocation2 + $0x60] sm:$0xff]  }
 0x122   :  { %666 = vmatprep.subr.bf16.mxu0 %v2718_v45  ;;  %v2749_v45 = vld [vmem:[#allocation2 + $0xe0] sm:$0xff]  }
 0x125   :  { %667 = vmatpush1.bf16.msra.mxu0 %v2716_v46 }
 0x126   :  { %668 = vmatprep.subr.bf16.mxu0 %v2724_v6  ;;  %v2772_v6 = vld [vmem:[#allocation2 + $0x90] sm:$0xff]  }
 0x129   :  { %669 = vmatpush1.bf16.msra.mxu0 %v2722_v8  ;;  %v2774_v8 = vld [vmem:[#allocation2 + $0xd8] sm:$0xff]  }
 0x12a   :  { %670 = vmatprep.subr.bf16.mxu0 %v2730_v10  ;;  %v2776_v10 = vld [vmem:[#allocation2 + $0x98] sm:$0xff]  }
 0x12d   :  { %671 = vmatpush1.bf16.msra.mxu0 %v2728_v12  ;;  %v480_v12 = vlaneseq }
 0x12e   :  { %672 = vmatprep.subr.bf16.mxu0 %v2736_v14 }
 0x131   :  { %673 = vmatpush1.bf16.msra.mxu0 %v2734_v16  ;;  %v2288_v16 = vld [vmem:[%s3178_s4 + $0x20] ss:$8 sm:$0xf] }
 0x132   :  { %674 = vmatprep.subr.bf16.mxu0 %v2742_v18 }
 0x135   :  { %675 = vmatpush1.bf16.msra.mxu0 %v2740_v20 }
 0x136   :  { %2484 = vmatprep.subr.bf16.mxu0 %v2746_v23 }
 0x1db   :  { %v298_v47 = vpop.f32.mrb[0].mxu1 }
 0x1dc   :  { %v2623_v48 = vpop.f32.mrb[1].mxu1 }
 0x1dd   :  { %v301_v49 = vpop.f32.mrb[2].mxu1  ;;  %v2751_v48 = vld [vmem:[#allocation2 + $0x128] sm:$0xff]  }
 0x1de   :  { %v2624_v50 = vpop.f32.mrb[3].mxu1 }
 0x1df   :  { %v2753_v50 = vld [vmem:[#allocation2 + $0xe8] sm:$0xff]  }
 0x1e3   :  { %v230_v51 = vpop.f32.mrb[8].mxu0 }
 0x1e4   :  { %v3090_v52 = vadd.f32 %v298_v47, %v230_v51  ;;  %v2611_v53 = vpop.f32.mrb[9].mxu0  ;;  %v2750_v47 = vld [vmem:[#allocation2 + $0xa8] sm:$0xff]   ;;  %v2754_v51 = vld [vmem:[#allocation2 + $0xb0] sm:$0xff]  }
 0x1e5   :  { %v233_v54 = vpop.f32.mrb[10].mxu0  ;;  %v2756_v53 = vld [vmem:[#allocation2 + $0x70] sm:$0xff]  }
 0x1e6   :  { %v3092_v55 = vadd.f32 %v301_v49, %v233_v54  ;;  %v2612_v56 = vpop.f32.mrb[11].mxu0  ;;  %v2752_v49 = vld [vmem:[#allocation2 + $0x68] sm:$0xff]   ;;  %v2757_v54 = vld [vmem:[#allocation2 + $0xf0] sm:$0xff]  }
 0x1e7   :  { %v2759_v56 = vld [vmem:[#allocation2 + $0x138] sm:$0xff]  }
 0x1eb   :  { %v345_v57 = vpop.f32.mrb[12].mxu0 }
 0x1ec   :  { %v2631_v58 = vpop.f32.mrb[13].mxu0 }
 0x1ed   :  { %v348_v59 = vpop.f32.mrb[14].mxu0  ;;  %v2761_v58 = vld [vmem:[#allocation2 + $0xf8] sm:$0xff]  }
 0x1ee   :  { %v352_v61 = vpack.c.bf16 %v348_v59, %v345_v57  ;;  %v2632_v62 = vpop.f32.mrb[15].mxu0  ;;  %v2760_v57 = vld [vmem:[#allocation2 + $0x78] sm:$0xff]   ;;  %v2762_v59 = vld [vmem:[#allocation2 + $0xc0] sm:$0xff]  }
 0x1ef   :  { %v2765_v62 = vld [vmem:[#allocation2 + $0x100] sm:$0xff]  }
 0x1f0   :  { %2642 = vmatmul.mubr.msk.bf16.vlgmr.msra.gmra.mrb[4].mxu1 %vm192_vm2, %v352_v61  ;;  %v2764_v61 = vld [vmem:[#allocation2 + $0x80] sm:$0xff]  }
 0x1f1   :  { %704 = vmatpush1.bf16.msra.mxu1 %v2701_v60  ;;  %735 = vmatprep.mubr.bf16.mxu1 %v2970_v22  ;;  %v2763_v60 = vld [vmem:[#allocation2 + $0x140] sm:$0xff]  }
 0x1f2   :  { %705 = vmatprep.subr.bf16.mxu1 %v2709_v63  ;;  %v2766_v63 = vld [vmem:[#allocation2 + $0xc8] sm:$0xff]  }
 0x1f5   :  { %706 = vmatpush1.bf16.msra.mxu1 %v2707_v1  ;;  %v2767_v1 = vld [vmem:[#allocation2 + $0x148] sm:$0xff]  }
 0x1f6   :  { %707 = vmatprep.subr.bf16.mxu1 %v2715_v2  ;;  %v2768_v2 = vld [vmem:[#allocation2 + $0x88] sm:$0xff]  }
 0x1f9   :  { %708 = vmatpush1.bf16.msra.mxu1 %v2713_v3  ;;  %v2769_v3 = vld [vmem:[#allocation2 + $0x108] sm:$0xff]  }
 0x1fa   :  { %709 = vmatprep.subr.bf16.mxu1 %v2721_v4  ;;  %v2770_v4 = vld [vmem:[#allocation2 + $0xd0] sm:$0xff]  }
 0x1fd   :  { %710 = vmatpush1.bf16.msra.mxu1 %v2719_v5  ;;  %v2771_v5 = vld [vmem:[#allocation2 + $0x150] sm:$0xff]  }
 0x1fe   :  { %711 = vmatprep.subr.bf16.mxu1 %v2727_v7  ;;  %v2773_v7 = vld [vmem:[#allocation2 + $0x110] sm:$0xff]  }
 0x201   :  { %712 = vmatpush1.bf16.msra.mxu1 %v2725_v9  ;;  %v2775_v9 = vld [vmem:[#allocation2 + $0x158] sm:$0xff]  }
 0x202   :  { %713 = vmatprep.subr.bf16.mxu1 %v2733_v11  ;;  %v2777_v11 = vld [vmem:[#allocation2 + $0x118] sm:$0xff]  }
 0x205   :  { %714 = vmatpush1.bf16.msra.mxu1 %v2731_v13  ;;  %v3104_v13 = vshrl.u32 %v480_v12, 7 }
 0x206   :  { %715 = vmatprep.subr.bf16.mxu1 %v2739_v15 }
 0x207   :  { %v482_v14 = vsub.s32 0, %v3104_v13  ;;  %v490_v15 = vsub.s32 2, %v3104_v13  ;;  %v494_v18 = vsub.s32 3, %v3104_v13 }
 0x209   :  { %716 = vmatpush1.bf16.msra.mxu1 %v2737_v17  ;;  %v486_v17 = vsub.s32 1, %v3104_v13  ;;  %v491_v20 = vrot.slane %v2288_v16, %v490_v15  ;;  %v495_v23 = vrot.slane %v2288_v16, %v494_v18 }
 0x20a   :  { %717 = vmatprep.subr.bf16.mxu1 %v2745_v19  ;;  %v483_v19 = vrot.slane %v2288_v16, %v482_v14 }
 0x20d   :  { %718 = vmatpush1.bf16.msra.mxu1 %v2743_v21  ;;  %v487_v21 = vrot.slane %v2288_v16, %v486_v17 }
 0x20e   :  { %2506 = vmatprep.subr.bf16.mxu1 %v2747_v24 }
 0x2c3   :  { %v422_v25 = vpop.f32.mrb[4].mxu1 }
 0x2c4   :  { %v429_v27 = vadd.f32 %v422_v25, %v3090_v52  ;;  %v2643_v28 = vpop.f32.mrb[5].mxu1  ;;  %v2755_v52 = vld [vmem:[#allocation2 + $0x130] sm:$0xff]  }
 0x2c5   :  { %v425_v29 = vpop.f32.mrb[6].mxu1 }
 0x2c6   :  { %v432_v30 = vadd.f32 %v431_v26, %v429_v27  ;;  %v430_v31 = vadd.f32 %v425_v29, %v3092_v55  ;;  %v2644_v32 = vpop.f32.mrb[7].mxu1  ;;  %v2758_v55 = vld [vmem:[#allocation2 + $0xb8] sm:$0xff]  }
 0x2c8   :  { %v434_v33 = vadd.f32 3.0, %v432_v30  ;;  %v433_v34 = vadd.f32 %v431_v26, %v430_v31 }
 0x2ca   :  { %v436_v35 = vmax.f32 %v434_v33, 0.0  ;;  %v435_v36 = vadd.f32 3.0, %v433_v34 }
 0x2cc   :  { %v438_v37 = vmin.f32 %v436_v35, 6.0  ;;  %v437_v38 = vmax.f32 %v435_v36, 0.0 }
 0x2ce   :  { %v440_v39 = vmul.f32 %v438_v37, %v432_v30  ;;  %v439_v40 = vmin.f32 %v437_v38, 6.0 }
 0x2d0   :  { %v441_v41 = vmul.f32 %v439_v40, %v433_v34  ;;  %v442_v42 = vmul.f32 0.16666667, %v440_v39 }
 0x2d2   :  { %v443_v43 = vmul.f32 0.16666667, %v441_v41 }
 0x2d4   :  { %v444_v46 = vpack.c.bf16 %v443_v43, %v442_v42 }
 0x2d6   :  { %693 = vmatmul.mubr.bf16.vlgmr.msra.gmra.mrb[16].mxu0 %v444_v46  ;;  %736 = vmatmul.mubr.bf16.vlgmr.msra.gmra.mrb[8].mxu1 %v444_v46 }
 0x2d7   :  { %2485 = vmatpush3.bf16.msra.mxu0 %v2748_v44  ;;  %2507 = vmatpush3.bf16.msra.mxu1 %v2749_v45 }
 0x2d8   :  { %2486 = vmatprep.subr.bf16.mxu0 %v2750_v47  ;;  %2508 = vmatprep.subr.bf16.mxu1 %v2751_v48 }
 0x2db   :  { %2487 = vmatpush3.bf16.msra.mxu0 %v2752_v49  ;;  %2509 = vmatpush3.bf16.msra.mxu1 %v2753_v50 }
 0x2dc   :  { %2488 = vmatprep.subr.bf16.mxu0 %v2754_v51  ;;  %2510 = vmatprep.subr.bf16.mxu1 %v2755_v52 }
 0x2df   :  { %2489 = vmatpush3.bf16.msra.mxu0 %v2756_v53  ;;  %2511 = vmatpush3.bf16.msra.mxu1 %v2757_v54 }
 0x2e0   :  { %2490 = vmatprep.subr.bf16.mxu0 %v2758_v55  ;;  %2512 = vmatprep.subr.bf16.mxu1 %v2759_v56 }
 0x2e3   :  { %2491 = vmatpush3.bf16.msra.mxu0 %v2760_v57  ;;  %2513 = vmatpush3.bf16.msra.mxu1 %v2761_v58 }
 0x2e4   :  { %2492 = vmatprep.subr.bf16.mxu0 %v2762_v59  ;;  %2514 = vmatprep.subr.bf16.mxu1 %v2763_v60 }
 0x2e7   :  { %2493 = vmatpush3.bf16.msra.mxu0 %v2764_v61  ;;  %2515 = vmatpush3.bf16.msra.mxu1 %v2765_v62 }
 0x2e8   :  { %2494 = vmatprep.subr.bf16.mxu0 %v2766_v63  ;;  %2516 = vmatprep.subr.bf16.mxu1 %v2767_v1 }
 0x2eb   :  { %2495 = vmatpush3.bf16.msra.mxu0 %v2768_v2  ;;  %2517 = vmatpush3.bf16.msra.mxu1 %v2769_v3 }
 0x2ec   :  { %2496 = vmatprep.subr.bf16.mxu0 %v2770_v4  ;;  %2518 = vmatprep.subr.bf16.mxu1 %v2771_v5 }
 0x2ef   :  { %2497 = vmatpush3.bf16.msra.mxu0 %v2772_v6  ;;  %2519 = vmatpush3.bf16.msra.mxu1 %v2773_v7 }
 0x2f0   :  { %2498 = vmatprep.subr.bf16.mxu0 %v2774_v8  ;;  %2520 = vmatprep.subr.bf16.mxu1 %v2775_v9 }
 0x2f3   :  { %2499 = vmatpush3.bf16.msra.mxu0 %v2776_v10  ;;  %2521 = vmatpush3.bf16.msra.mxu1 %v2777_v11 }
 0x2f4   :  { %2645 = vmatprep.subr.bf16.mxu0 %v2968_v0  ;;  %2657 = vmatprep.subr.bf16.mxu1 %v2968_v0 }
 0x3a9   :  { %v694_v24 = vpop.f32.mrb[16].mxu0  ;;  %v737_v25 = vpop.f32.mrb[8].mxu1 }
 0x3aa   :  { %v695_v26 = vadd.f32 %v694_v24, %v483_v19  ;;  %v738_v27 = vadd.f32 %v737_v25, %v491_v20  ;;  %v696_v28 = vpop.f32.mrb[17].mxu0  ;;  %v739_v29 = vpop.f32.mrb[9].mxu1 }
 0x3ab   :  { %v697_v30 = vadd.f32 %v696_v28, %v487_v21  ;;  %v740_v31 = vadd.f32 %v739_v29, %v495_v23  ;;  %v698_v32 = vpop.f32.mrb[18].mxu0  ;;  %v741_v33 = vpop.f32.mrb[10].mxu1  ;;  %v2779_v28 = vld [vmem:[#allocation2 + $0x168] sm:$0xff]   ;;  %v2780_v29 = vld [vmem:[#allocation2 + $0x170] sm:$0xff]  }
 0x3ac   :  { %v746_v34 = vadd.f32 3.0, %v695_v26  ;;  %v748_v35 = vadd.f32 3.0, %v738_v27  ;;  %v699_v36 = vadd.f32 %v698_v32, %v483_v19  ;;  %v742_v37 = vadd.f32 %v741_v33, %v491_v20  ;;  %v700_v38 = vpop.f32.mrb[19].mxu0  ;;  %v743_v39 = vpop.f32.mrb[11].mxu1 }
 0x3ad   :  { %v747_v40 = vadd.f32 3.0, %v697_v30  ;;  %v749_v41 = vadd.f32 3.0, %v740_v31  ;;  %v701_v42 = vadd.f32 %v700_v38, %v487_v21  ;;  %v744_v43 = vadd.f32 %v743_v39, %v495_v23 }
 0x3ae   :  { %v754_v44 = vmax.f32 %v746_v34, 0.0  ;;  %v756_v45 = vmax.f32 %v748_v35, 0.0  ;;  %v750_v46 = vadd.f32 3.0, %v699_v36  ;;  %v752_v47 = vadd.f32 3.0, %v742_v37 }
 0x3af   :  { %v755_v48 = vmax.f32 %v747_v40, 0.0  ;;  %v757_v49 = vmax.f32 %v749_v41, 0.0  ;;  %v751_v50 = vadd.f32 3.0, %v701_v42  ;;  %v753_v51 = vadd.f32 3.0, %v744_v43 }
 0x3b0   :  { %v762_v52 = vmin.f32 %v754_v44, 6.0  ;;  %v764_v53 = vmin.f32 %v756_v45, 6.0  ;;  %v758_v54 = vmax.f32 %v750_v46, 0.0  ;;  %v760_v55 = vmax.f32 %v752_v47, 0.0  ;;  %v1128_v45 = vld [vmem:[%s3178_s4 + $0x1a0] sm:$0x3] }
 0x3b1   :  { %v763_v56 = vmin.f32 %v755_v48, 6.0  ;;  %v765_v57 = vmin.f32 %v757_v49, 6.0  ;;  %v759_v58 = vmax.f32 %v751_v50, 0.0  ;;  %v761_v59 = vmax.f32 %v753_v51, 0.0  ;;  %v1183_v47 = vld [vmem:[#allocation2 + $0x1a0] sm:$0x7] }
 0x3b2   :  { %v770_v60 = vmul.f32 %v762_v52, %v695_v26  ;;  %v772_v61 = vmul.f32 %v764_v53, %v738_v27  ;;  %v766_v62 = vmin.f32 %v758_v54, 6.0  ;;  %v768_v63 = vmin.f32 %v760_v55, 6.0  ;;  %v2778_v27 = vld [vmem:[#allocation2 + $0x160] sm:$0xff]   ;;  %v2783_v53 = vld [vmem:[#allocation2 + $0x188] sm:$0xff]   ;;  %v2784_v54 = vld [vmem:[#allocation2 + $0x190] sm:$0xff]  }
 0x3b3   :  { %v771_v1 = vmul.f32 %v763_v56, %v697_v30  ;;  %v773_v2 = vmul.f32 %v765_v57, %v740_v31  ;;  %v767_v3 = vmin.f32 %v759_v58, 6.0  ;;  %v769_v4 = vmin.f32 %v761_v59, 6.0  ;;  %v2781_v30 = vld [vmem:[#allocation2 + $0x178] sm:$0xff]   ;;  %v1181_v50 = vld [vmem:[%s3175_s1] sm:$0x3] }
 0x3b4   :  { %v774_v5 = vmul.f32 %v766_v62, %v699_v36  ;;  %v776_v6 = vmul.f32 %v768_v63, %v742_v37  ;;  %v778_v7 = vmul.f32 0.16666667, %v770_v60  ;;  %v780_v8 = vmul.f32 0.16666667, %v772_v61  ;;  %v2782_v52 = vld [vmem:[#allocation2 + $0x180] sm:$0xff]   ;;  %v2785_v55 = vld [vmem:[#allocation2 + $0x198] sm:$0xff]  }
 0x3b5   :  { %v775_v9 = vmul.f32 %v767_v3, %v701_v42  ;;  %v777_v10 = vmul.f32 %v769_v4, %v744_v43  ;;  %v779_v11 = vmul.f32 0.16666667, %v771_v1  ;;  %v781_v19 = vmul.f32 0.16666667, %v773_v2  ;;  %v2786_v56 = vld [vmem:[#allocation4 + $0x200] ss:$16 sps:$4 sm:$0xff]  }
 0x3b6   :  { %v782_v12 = vmul.f32 0.16666667, %v774_v5  ;;  %v784_v16 = vmul.f32 0.16666667, %v776_v6  ;;  %v1129_v48 = vpack.c.bf16 %v1128_v45, %v1128_v45  ;;  %v1191_v49 = vsel %vm1189_vm3, %v1183_v47, 0 }
 0x3b7   :  { %v783_v20 = vmul.f32 0.16666667, %v775_v9  ;;  %v785_v21 = vmul.f32 0.16666667, %v777_v10  ;;  %v1182_v51 = vpack.c.bf16 %v1181_v50, %v1181_v50  ;;  %v2788_v57 = vld [vmem:[#allocation4 + $0x204] ss:$16 sps:$4 sm:$0xff]  }
 0x3b8   :  { %v786_v23 = vpack.c.bf16 %v782_v12, %v778_v7  ;;  %v788_v24 = vpack.c.bf16 %v784_v16, %v780_v8  ;;  %v2791_v58 = vld [vmem:[#allocation4 + $0x20c] ss:$16 sps:$4 sm:$0xff]   ;;  %v2794_v59 = vld [vmem:[#allocation4 + $0x224] ss:$16 sps:$4 sm:$0xff]   ;;  %v2792_v60 = vld [vmem:[#allocation4 + $0x220] ss:$16 sps:$4 sm:$0xff]  }
 0x3b9   :  { %v787_v25 = vpack.c.bf16 %v783_v20, %v779_v11  ;;  %v789_v26 = vpack.c.bf16 %v785_v21, %v781_v19  ;;  %v2800_v61 = vld [vmem:[#allocation4 + $0x244] ss:$16 sps:$4 sm:$0xff]   ;;  %v2798_v62 = vld [vmem:[#allocation4 + $0x240] ss:$16 sps:$4 sm:$0xff]   ;;  %v1184_v11 = vld [vmem:[%s3178_s4 + $0x60] ss:$0 sm:$0xff] }
 0x3ba   :  { %v2806_v63 = vld [vmem:[#allocation4 + $0x264] ss:$16 sps:$4 sm:$0xff]   ;;  %v2804_v1 = vld [vmem:[#allocation4 + $0x260] ss:$16 sps:$4 sm:$0xff]  }
 0x3bb   :  { %1078 = vmatprep.mubr.bf16.mxu0 %v787_v25  ;;  %1119 = vmatprep.mubr.bf16.mxu1 %v789_v26  ;;  %v2810_v2 = vld [vmem:[#allocation4 + $0x280] ss:$16 sps:$4 sm:$0xff]   ;;  %v2818_v3 = vld [vmem:[#allocation4 + $0x2a4] ss:$16 sps:$4 sm:$0xff]   ;;  %v2797_v26 = vld [vmem:[#allocation4 + $0x22c] ss:$16 sps:$4 sm:$0xff]  }
 0x3bc   :  { %1079 = vmatmul.mubr.bf16.vlgmr.msra.gmra.mrb[20].mxu0 %v786_v23  ;;  %1120 = vmatmul.mubr.bf16.vlgmr.msra.gmra.mrb[12].mxu1 %v788_v24  ;;  %v2816_v4 = vld [vmem:[#allocation4 + $0x2a0] ss:$16 sps:$4 sm:$0xff]   ;;  %v2824_v5 = vld [vmem:[#allocation4 + $0x2c4] ss:$16 sps:$4 sm:$0xff]   ;;  %v2789_v24 = vld [vmem:[#allocation4 + $0x208] ss:$16 sps:$4 sm:$0xff]  }
 0x3bd   :  { %2647 = vmatprep.mubr.msk.bf16.mxu0 %vm2969_vm0, %v2968_v0  ;;  %2673 = vmatprep.mubr.msk.bf16.mxu1 %vm2969_vm0, %v2968_v0  ;;  %v2822_v6 = vld [vmem:[#allocation4 + $0x2c0] ss:$16 sps:$4 sm:$0xff]  }
 0x3be   :  { %2658 = vmatpush3.bf16.msra.mxu1 %v2778_v27  ;;  %v2795_v27 = vld [vmem:[#allocation4 + $0x228] ss:$16 sps:$4 sm:$0xff]  }
 0x3bf   :  { %2659 = vmatprep.subr.bf16.mxu1 %v2968_v0 }
 0x3c2   :  { %2660 = vmatpush3.bf16.msra.mxu1 %v2779_v28  ;;  %v2803_v28 = vld [vmem:[#allocation4 + $0x24c] ss:$16 sps:$4 sm:$0xff]  }
 0x3c3   :  { %2661 = vmatprep.subr.bf16.mxu1 %v2968_v0 }
 0x3c6   :  { %2662 = vmatpush3.bf16.msra.mxu1 %v2780_v29  ;;  %v2801_v29 = vld [vmem:[#allocation4 + $0x248] ss:$16 sps:$4 sm:$0xff]  }
 0x3c7   :  { %2663 = vmatprep.subr.bf16.mxu1 %v2968_v0 }
 0x3ca   :  { %2664 = vmatpush3.bf16.msra.mxu1 %v2781_v30  ;;  %v2809_v30 = vld [vmem:[#allocation4 + $0x26c] ss:$16 sps:$4 sm:$0xff]  }
 0x3cb   :  { %2665 = vmatprep.subr.bf16.mxu1 %v2968_v0 }
 0x3ce   :  { %2666 = vmatpush3.bf16.msra.mxu1 %v2782_v52  ;;  %v2837_v52 = vld [vmem:[#allocation4 + $0x108] ss:$16 sps:$4 sm:$0xff]  }
 0x3cf   :  { %2667 = vmatprep.subr.bf16.mxu1 %v2968_v0 }
 0x3d2   :  { %2668 = vmatpush3.bf16.msra.mxu1 %v2783_v53 }
 0x3d3   :  { %2669 = vmatprep.subr.bf16.mxu1 %v2968_v0 }
 0x3d6   :  { %2670 = vmatpush3.bf16.msra.mxu1 %v2784_v54  ;;  %v2842_v54 = vld [vmem:[#allocation4 + $0x124] ss:$16 sps:$4 sm:$0xff]  }
 0x3d7   :  { %2671 = vmatprep.subr.bf16.mxu1 %v2968_v0 }
 0x3da   :  { %2672 = vmatpush3.bf16.msra.mxu1 %v2785_v55  ;;  %v2845_v55 = vld [vmem:[#allocation4 + $0x12c] ss:$16 sps:$4 sm:$0xff]  }
 0x3db   :  { %1608 = vmatprep.subr.bf16.mxu1 %v2791_v58  ;;  %v2848_v58 = vld [vmem:[#allocation4 + $0x144] ss:$16 sps:$4 sm:$0xff]  }
 0x48f   :  { %v2500_v31 = vpop.f32.mrb[20].mxu0  ;;  %v2522_v32 = vpop.f32.mrb[12].mxu1 }
 0x490   :  { %v2501_v33 = vpop.f32.mrb[21].mxu0  ;;  %v2523_v34 = vpop.f32.mrb[13].mxu1 }
 0x491   :  { %v2502_v35 = vadd.f32 %v2501_v33, %v2500_v31  ;;  %v2524_v36 = vadd.f32 %v2523_v34, %v2522_v32  ;;  %v2503_v37 = vpop.f32.mrb[22].mxu0  ;;  %v2525_v38 = vpop.f32.mrb[14].mxu1  ;;  %v2807_v31 = vld [vmem:[#allocation4 + $0x268] ss:$16 sps:$4 sm:$0xff]   ;;  %v2815_v32 = vld [vmem:[#allocation4 + $0x28c] ss:$16 sps:$4 sm:$0xff]  }
 0x492   :  { %v2504_v39 = vpop.f32.mrb[23].mxu0  ;;  %v2526_v40 = vpop.f32.mrb[15].mxu1  ;;  %v2813_v33 = vld [vmem:[#allocation4 + $0x288] ss:$16 sps:$4 sm:$0xff]   ;;  %v2821_v34 = vld [vmem:[#allocation4 + $0x2ac] ss:$16 sps:$4 sm:$0xff]  }
 0x493   :  { %v1122_v41 = vadd.f32 %v2524_v36, %v2502_v35  ;;  %v2505_v42 = vadd.f32 %v2504_v39, %v2503_v37  ;;  %v2527_v43 = vadd.f32 %v2526_v40, %v2525_v38  ;;  %v2819_v35 = vld [vmem:[#allocation4 + $0x2a8] ss:$16 sps:$4 sm:$0xff]   ;;  %v2827_v36 = vld [vmem:[#allocation4 + $0x2cc] ss:$16 sps:$4 sm:$0xff]   ;;  %v2830_v38 = vld [vmem:[#allocation4 + $0x2e4] ss:$16 sps:$4 sm:$0xff]  }
 0x494   :  { %v2825_v37 = vld [vmem:[#allocation4 + $0x2c8] ss:$16 sps:$4 sm:$0xff]   ;;  %v2833_v39 = vld [vmem:[#allocation4 + $0x2ec] ss:$16 sps:$4 sm:$0xff]   ;;  %v2828_v40 = vld [vmem:[#allocation4 + $0x2e0] ss:$16 sps:$4 sm:$0xff]  }
 0x495   :  { %v1125_v44 = vadd.f32 %v2527_v43, %v2505_v42  ;;  %v2836_v42 = vld [vmem:[#allocation4 + $0x104] ss:$16 sps:$4 sm:$0xff]   ;;  %v2839_v43 = vld [vmem:[#allocation4 + $0x10c] ss:$16 sps:$4 sm:$0xff]  }
 0x497   :  { %v1130_v46 = vpack.c.bf16 %v1125_v44, %v1122_v41  ;;  %v2831_v41 = vld [vmem:[#allocation4 + $0x2e8] ss:$16 sps:$4 sm:$0xff]  }
 0x498   :  { %v1251_v44 = vld [vmem:[%s3178_s4 + $0x80] ss:$0 sm:$0xff] }
 0x499   :  { %2646 = vmatpush3.bf16.msra.mxu0 %v1130_v46 }
 0x49a   :  { %2651 = vmatprep.subr.bf16.mxu0 %v2968_v0 }
 0x49c   :  { %2648 = vmatmul.mubr.msk.bf16.vlgmr.msra.gmra.mrb[24].mxu0 %vm1132_vm4, %v1129_v48 }
 0x49d   :  { %2652 = vmatpush3.bf16.msra.mxu0 %v1191_v49  ;;  %2653 = vmatprep.mubr.msk.bf16.mxu0 %vm2969_vm0, %v2968_v0  ;;  %v2812_v0 = vld [vmem:[#allocation4 + $0x284] ss:$16 sps:$4 sm:$0xff]  }
 0x49e   :  { %1567 = vmatprep.subr.bf16.mxu0 %v2788_v57  ;;  %v2843_v57 = vld [vmem:[#allocation4 + $0x128] ss:$16 sps:$4 sm:$0xff]  }
 0x4a4   :  { %2654 = vmatmul.mubr.msk.bf16.vlgmr.msra.gmra.mrb[28].mxu0 %vm1185_vm5, %v1182_v51  ;;  %v2834_v51 = vld [vmem:[#allocation4 + $0x100] ss:$16 sps:$4 sm:$0xff]  }
 0x4a5   :  { %1599 = vmatprep.mubr.bf16.mxu0 %v2970_v22  ;;  %1568 = vmatpush1.bf16.msra.mxu0 %v2786_v56  ;;  %v2840_v56 = vld [vmem:[#allocation4 + $0x120] ss:$16 sps:$4 sm:$0xff]  }
 0x4a6   :  { %1569 = vmatprep.subr.bf16.mxu0 %v2794_v59  ;;  %v2851_v59 = vld [vmem:[#allocation4 + $0x14c] ss:$16 sps:$4 sm:$0xff]  }
 0x4a9   :  { %1570 = vmatpush1.bf16.msra.mxu0 %v2792_v60  ;;  %v1131_v60 = vld [vmem:[%s3178_s4 + $0x40] ss:$0 sm:$0xff] }
 0x4aa   :  { %1571 = vmatprep.subr.bf16.mxu0 %v2800_v61  ;;  %v2846_v61 = vld [vmem:[#allocation4 + $0x140] ss:$16 sps:$4 sm:$0xff]  }
 0x4ad   :  { %1572 = vmatpush1.bf16.msra.mxu0 %v2798_v62  ;;  %v2849_v62 = vld [vmem:[#allocation4 + $0x148] ss:$16 sps:$4 sm:$0xff]  }
 0x4ae   :  { %1573 = vmatprep.subr.bf16.mxu0 %v2806_v63 }
 0x4b1   :  { %1574 = vmatpush1.bf16.msra.mxu0 %v2804_v1  ;;  %v2854_v1 = vld [vmem:[#allocation4 + $0x164] ss:$16 sps:$4 sm:$0xff]  }
 0x4b2   :  { %1575 = vmatprep.subr.bf16.mxu0 %v2812_v0  ;;  %v2857_v0 = vld [vmem:[#allocation4 + $0x16c] ss:$16 sps:$4 sm:$0xff]  }
 0x4b5   :  { %1576 = vmatpush1.bf16.msra.mxu0 %v2810_v2  ;;  %v2852_v2 = vld [vmem:[#allocation4 + $0x160] ss:$16 sps:$4 sm:$0xff]  }
 0x4b6   :  { %1577 = vmatprep.subr.bf16.mxu0 %v2818_v3  ;;  %v2855_v3 = vld [vmem:[#allocation4 + $0x168] ss:$16 sps:$4 sm:$0xff]  }
 0x4b9   :  { %1578 = vmatpush1.bf16.msra.mxu0 %v2816_v4 }
 0x4ba   :  { %1579 = vmatprep.subr.bf16.mxu0 %v2824_v5  ;;  %v2860_v5 = vld [vmem:[#allocation4 + $0x184] ss:$16 sps:$4 sm:$0xff]  }
 0x4bd   :  { %1580 = vmatpush1.bf16.msra.mxu0 %v2822_v6  ;;  %v2863_v6 = vld [vmem:[#allocation4 + $0x18c] ss:$16 sps:$4 sm:$0xff]  }
 0x4be   :  { %1581 = vmatprep.subr.bf16.mxu0 %v2830_v38  ;;  %v2889_v38 = vld [vmem:[#allocation2 + $0x230] sm:$0xff]  }
 0x4c1   :  { %1582 = vmatpush1.bf16.msra.mxu0 %v2828_v40  ;;  %v2891_v40 = vld [vmem:[#allocation2 + $0x278] sm:$0xff]  }
 0x4c2   :  { %1809 = vmatprep.subr.bf16.mxu0 %v2836_v42  ;;  %v2893_v42 = vld [vmem:[#allocation2 + $0x238] sm:$0xff]  }
 0x56f   :  { %v3142_v7 = vpop.f32.mrb[24].mxu0 }
 0x570   :  { %v2649_v8 = vpop.f32.mrb[25].mxu0  ;;  %v1171_v63 = vadd.f32 %v3142_v7, %v1131_v60  ;;  %v2866_v7 = vld [vmem:[#allocation4 + $0x1a4] ss:$16 sps:$4 sm:$0xff]   ;;  %v2911_v60 = vld [vmem:[#allocation2 + $0x2a0] sm:$0xff]  }
 0x571   :  { %v1173_v9 = vpop.f32.mrb[26].mxu0  ;;  %v2861_v8 = vld [vmem:[#allocation4 + $0x188] ss:$16 sps:$4 sm:$0xff]  }
 0x572   :  { %v2650_v10 = vpop.f32.mrb[27].mxu0  ;;  %v1176_v4 = vadd.f32 3.0, %v1171_v63 }
 0x573   :  { %v2869_v10 = vld [vmem:[#allocation4 + $0x1ac] ss:$16 sps:$4 sm:$0xff]  }
 0x574   :  { %v1177_v9 = vmax.f32 %v1176_v4, 0.0 }
 0x577   :  { %v1227_v12 = vpop.f32.mrb[28].mxu0 }
 0x578   :  { %v1228_v16 = vadd.f32 %v1227_v12, %v1184_v11  ;;  %v2655_v19 = vpop.f32.mrb[29].mxu0  ;;  %v2864_v11 = vld [vmem:[#allocation4 + $0x1a0] ss:$16 sps:$4 sm:$0xff]   ;;  %v2867_v12 = vld [vmem:[#allocation4 + $0x1a8] ss:$16 sps:$4 sm:$0xff]  }
 0x579   :  { %v1230_v20 = vpop.f32.mrb[30].mxu0  ;;  %v2872_v19 = vld [vmem:[#allocation4 + $0x1c4] ss:$16 sps:$4 sm:$0xff]  }
 0x57a   :  { %v1233_v21 = vmax.f32 %v1228_v16, 0.0  ;;  %v2656_v23 = vpop.f32.mrb[31].mxu0  ;;  %v1178_v16 = vmin.f32 %v1177_v9, 6.0  ;;  %v2875_v20 = vld [vmem:[#allocation4 + $0x1cc] ss:$16 sps:$4 sm:$0xff]  }
 0x57b   :  { %v2873_v23 = vld [vmem:[#allocation4 + $0x1c8] ss:$16 sps:$4 sm:$0xff]  }
 0x57c   :  { %v1234_v25 = vpack.c.bf16 %v1233_v21, %v1233_v21  ;;  %v2870_v21 = vld [vmem:[#allocation4 + $0x1c0] ss:$16 sps:$4 sm:$0xff]  }
 0x57e   :  { %2674 = vmatmul.mubr.bf16.vlgmr.msra.gmra.mrb[16].mxu1 %v1234_v25  ;;  %v2878_v25 = vld [vmem:[#allocation4 + $0x1e4] ss:$16 sps:$4 sm:$0xff]  }
 0x57f   :  { %1609 = vmatpush1.bf16.msra.mxu1 %v2789_v24  ;;  %1640 = vmatprep.mubr.bf16.mxu1 %v2970_v22  ;;  %v1179_v24 = vmul.f32 %v1178_v16, %v1171_v63 }
 0x580   :  { %1610 = vmatprep.subr.bf16.mxu1 %v2797_v26  ;;  %v2881_v26 = vld [vmem:[#allocation4 + $0x1ec] ss:$16 sps:$4 sm:$0xff]  }
 0x583   :  { %1611 = vmatpush1.bf16.msra.mxu1 %v2795_v27  ;;  %v2876_v27 = vld [vmem:[#allocation4 + $0x1e0] ss:$16 sps:$4 sm:$0xff]  }
 0x584   :  { %1612 = vmatprep.subr.bf16.mxu1 %v2803_v28  ;;  %v2879_v28 = vld [vmem:[#allocation4 + $0x1e8] ss:$16 sps:$4 sm:$0xff]  }
 0x587   :  { %1613 = vmatpush1.bf16.msra.mxu1 %v2801_v29  ;;  %v1180_v29 = vmul.f32 0.16666667, %v1179_v24 }
 0x588   :  { %1614 = vmatprep.subr.bf16.mxu1 %v2809_v30 }
 0x589   :  { %v1341_v30 = vpack.c.bf16 %v1180_v29, %v1180_v29 }
 0x58b   :  { %1615 = vmatpush1.bf16.msra.mxu1 %v2807_v31  ;;  %v2882_v31 = vld [vmem:[#allocation2 + $0x1e8] sm:$0xff]  }
 0x58c   :  { %1616 = vmatprep.subr.bf16.mxu1 %v2815_v32  ;;  %v2883_v32 = vld [vmem:[#allocation2 + $0x268] sm:$0xff]  }
 0x58f   :  { %1617 = vmatpush1.bf16.msra.mxu1 %v2813_v33  ;;  %v2884_v33 = vld [vmem:[#allocation2 + $0x1a8] sm:$0xff]  }
 0x590   :  { %1618 = vmatprep.subr.bf16.mxu1 %v2821_v34  ;;  %v2885_v34 = vld [vmem:[#allocation2 + $0x228] sm:$0xff]  }
 0x593   :  { %1619 = vmatpush1.bf16.msra.mxu1 %v2819_v35  ;;  %v2886_v35 = vld [vmem:[#allocation2 + $0x1f0] sm:$0xff]  }
 0x594   :  { %1620 = vmatprep.subr.bf16.mxu1 %v2827_v36  ;;  %v2887_v36 = vld [vmem:[#allocation2 + $0x270] sm:$0xff]  }
 0x597   :  { %1621 = vmatpush1.bf16.msra.mxu1 %v2825_v37  ;;  %v2888_v37 = vld [vmem:[#allocation2 + $0x1b0] sm:$0xff]  }
 0x598   :  { %1622 = vmatprep.subr.bf16.mxu1 %v2833_v39  ;;  %v2890_v39 = vld [vmem:[#allocation2 + $0x1f8] sm:$0xff]  }
 0x59b   :  { %1623 = vmatpush1.bf16.msra.mxu1 %v2831_v41  ;;  %v2892_v41 = vld [vmem:[#allocation2 + $0x1b8] sm:$0xff]  }
 0x59c   :  { %1850 = vmatprep.subr.bf16.mxu1 %v2839_v43  ;;  %v2894_v43 = vld [vmem:[#allocation2 + $0x200] sm:$0xff]  }
 0x651   :  { %v1334_v45 = vpop.f32.mrb[16].mxu1 }
 0x652   :  { %v1335_v46 = vadd.f32 %v1334_v45, %v1251_v44  ;;  %v2675_v47 = vpop.f32.mrb[17].mxu1  ;;  %v2895_v44 = vld [vmem:[#allocation2 + $0x280] sm:$0xff]  }
 0x653   :  { %v1337_v48 = vpop.f32.mrb[18].mxu1  ;;  %v2896_v45 = vld [vmem:[#allocation2 + $0x1c0] sm:$0xff]   ;;  %v2898_v47 = vld [vmem:[#allocation2 + $0x208] sm:$0xff]  }
 0x654   :  { %v1340_v49 = vmax.f32 %v1335_v46, 0.0  ;;  %v2676_v50 = vpop.f32.mrb[19].mxu1  ;;  %v2897_v46 = vld [vmem:[#allocation2 + $0x240] sm:$0xff]   ;;  %v2899_v48 = vld [vmem:[#allocation2 + $0x288] sm:$0xff]  }
 0x655   :  { %v2901_v50 = vld [vmem:[#allocation2 + $0x248] sm:$0xff]  }
 0x656   :  { %v1374_v53 = vpack.c.bf16 %v1340_v49, %v1340_v49  ;;  %v2900_v49 = vld [vmem:[#allocation2 + $0x1c8] sm:$0xff]  }
 0x658   :  { %1600 = vmatmul.mubr.bf16.vlgmr.msra.gmra.mrb[32].mxu0 %v1374_v53  ;;  %1641 = vmatmul.mubr.bf16.vlgmr.msra.gmra.mrb[20].mxu1 %v1374_v53  ;;  %v2904_v53 = vld [vmem:[#allocation2 + $0x1d0] sm:$0xff]  }
 0x659   :  { %1810 = vmatpush1.bf16.msra.mxu0 %v2834_v51  ;;  %1851 = vmatpush1.bf16.msra.mxu1 %v2837_v52  ;;  %v2902_v51 = vld [vmem:[#allocation2 + $0x210] sm:$0xff]  }
 0x65a   :  { %1811 = vmatprep.subr.bf16.mxu0 %v2842_v54  ;;  %1852 = vmatprep.subr.bf16.mxu1 %v2845_v55  ;;  %v2903_v52 = vld [vmem:[#allocation2 + $0x290] sm:$0xff]   ;;  %v2906_v55 = vld [vmem:[#allocation2 + $0x218] sm:$0xff]  }
 0x65b   :  { %1841 = vmatprep.mubr.bf16.mxu0 %v2970_v22  ;;  %1882 = vmatprep.mubr.bf16.mxu1 %v2970_v22  ;;  %v2858_v22 = vld [vmem:[#allocation4 + $0x180] ss:$16 sps:$4 sm:$0xff]   ;;  %v2905_v54 = vld [vmem:[#allocation2 + $0x250] sm:$0xff]  }
 0x65d   :  { %1812 = vmatpush1.bf16.msra.mxu0 %v2840_v56  ;;  %1853 = vmatpush1.bf16.msra.mxu1 %v2843_v57  ;;  %v2907_v56 = vld [vmem:[#allocation2 + $0x298] sm:$0xff]  }
 0x65e   :  { %1813 = vmatprep.subr.bf16.mxu0 %v2848_v58  ;;  %1854 = vmatprep.subr.bf16.mxu1 %v2851_v59  ;;  %v2908_v57 = vld [vmem:[#allocation2 + $0x1d8] sm:$0xff]   ;;  %v2910_v59 = vld [vmem:[#allocation2 + $0x220] sm:$0xff]  }
 0x65f   :  { %v2909_v58 = vld [vmem:[#allocation2 + $0x258] sm:$0xff]  }
 0x661   :  { %1814 = vmatpush1.bf16.msra.mxu0 %v2846_v61  ;;  %1855 = vmatpush1.bf16.msra.mxu1 %v2849_v62  ;;  %v2912_v61 = vld [vmem:[#allocation2 + $0x1e0] sm:$0xff]  }
 0x662   :  { %1815 = vmatprep.subr.bf16.mxu0 %v2854_v1  ;;  %1856 = vmatprep.subr.bf16.mxu1 %v2857_v0  ;;  %v2913_v62 = vld [vmem:[#allocation2 + $0x260] sm:$0xff]  }
 0x665   :  { %1816 = vmatpush1.bf16.msra.mxu0 %v2852_v2  ;;  %1857 = vmatpush1.bf16.msra.mxu1 %v2855_v3 }
 0x666   :  { %1817 = vmatprep.subr.bf16.mxu0 %v2860_v5  ;;  %1858 = vmatprep.subr.bf16.mxu1 %v2863_v6 }
 0x669   :  { %1818 = vmatpush1.bf16.msra.mxu0 %v2858_v22  ;;  %1859 = vmatpush1.bf16.msra.mxu1 %v2861_v8  ;;  %v2427_v22 = vld [vmem:[%s3178_s4 + $0xa0] ss:$8 sm:$0xf] }
 0x66a   :  { %1819 = vmatprep.subr.bf16.mxu0 %v2866_v7  ;;  %1860 = vmatprep.subr.bf16.mxu1 %v2869_v10  ;;  %v1897_v8 = vrot.slane %v2427_v22, %v482_v14  ;;  %v1905_v9 = vrot.slane %v2427_v22, %v490_v15 }
 0x66d   :  { %1820 = vmatpush1.bf16.msra.mxu0 %v2864_v11  ;;  %1861 = vmatpush1.bf16.msra.mxu1 %v2867_v12  ;;  %v1901_v11 = vrot.slane %v2427_v22, %v486_v17  ;;  %v1909_v12 = vrot.slane %v2427_v22, %v494_v18 }
 0x66e   :  { %1821 = vmatprep.subr.bf16.mxu0 %v2872_v19  ;;  %1862 = vmatprep.subr.bf16.mxu1 %v2875_v20 }
 0x671   :  { %1822 = vmatpush1.bf16.msra.mxu0 %v2870_v21  ;;  %1863 = vmatpush1.bf16.msra.mxu1 %v2873_v23 }
 0x672   :  { %1823 = vmatprep.subr.bf16.mxu0 %v2878_v25  ;;  %1864 = vmatprep.subr.bf16.mxu1 %v2881_v26 }
 0x675   :  { %1824 = vmatpush1.bf16.msra.mxu0 %v2876_v27  ;;  %1865 = vmatpush1.bf16.msra.mxu1 %v2879_v28 }
 0x676   :  { %2541 = vmatprep.subr.bf16.mxu0 %v2882_v31  ;;  %2563 = vmatprep.subr.bf16.mxu1 %v2883_v32 }
 0x678   :  { %1842 = vmatmul.mubr.bf16.vlgmr.msra.gmra.mrb[36].mxu0 %v1341_v30  ;;  %1883 = vmatmul.mubr.bf16.vlgmr.msra.gmra.mrb[24].mxu1 %v1341_v30 }
 0x679   :  { %2542 = vmatpush3.bf16.msra.mxu0 %v2884_v33  ;;  %2564 = vmatpush3.bf16.msra.mxu1 %v2885_v34 }
 0x67a   :  { %2543 = vmatprep.subr.bf16.mxu0 %v2886_v35  ;;  %2565 = vmatprep.subr.bf16.mxu1 %v2887_v36 }
 0x67d   :  { %2544 = vmatpush3.bf16.msra.mxu0 %v2888_v37  ;;  %2566 = vmatpush3.bf16.msra.mxu1 %v2889_v38  ;;  %v1990_v38 = vld [vmem:[%s3178_s4 + $0xc0] ss:$0 sm:$0xff] }
 0x67e   :  { %2545 = vmatprep.subr.bf16.mxu0 %v2890_v39  ;;  %2567 = vmatprep.subr.bf16.mxu1 %v2891_v40 }
 0x681   :  { %2546 = vmatpush3.bf16.msra.mxu0 %v2892_v41  ;;  %2568 = vmatpush3.bf16.msra.mxu1 %v2893_v42 }
 0x682   :  { %2547 = vmatprep.subr.bf16.mxu0 %v2894_v43  ;;  %2569 = vmatprep.subr.bf16.mxu1 %v2895_v44 }
 0x685   :  { %2548 = vmatpush3.bf16.msra.mxu0 %v2896_v45  ;;  %2570 = vmatpush3.bf16.msra.mxu1 %v2897_v46 }
 0x686   :  { %2549 = vmatprep.subr.bf16.mxu0 %v2898_v47  ;;  %2571 = vmatprep.subr.bf16.mxu1 %v2899_v48 }
 0x689   :  { %2550 = vmatpush3.bf16.msra.mxu0 %v2900_v49  ;;  %2572 = vmatpush3.bf16.msra.mxu1 %v2901_v50 }
 0x68a   :  { %2551 = vmatprep.subr.bf16.mxu0 %v2902_v51  ;;  %2573 = vmatprep.subr.bf16.mxu1 %v2903_v52 }
 0x68d   :  { %2552 = vmatpush3.bf16.msra.mxu0 %v2904_v53  ;;  %2574 = vmatpush3.bf16.msra.mxu1 %v2905_v54 }
 0x68e   :  { %2553 = vmatprep.subr.bf16.mxu0 %v2906_v55  ;;  %2575 = vmatprep.subr.bf16.mxu1 %v2907_v56 }
 0x691   :  { %2554 = vmatpush3.bf16.msra.mxu0 %v2908_v57  ;;  %2576 = vmatpush3.bf16.msra.mxu1 %v2909_v58 }
 0x692   :  { %2555 = vmatprep.subr.bf16.mxu0 %v2910_v59  ;;  %2577 = vmatprep.subr.bf16.mxu1 %v2911_v60 }
 0x695   :  { %2556 = vmatpush3.bf16.msra.mxu0 %v2912_v61  ;;  %2578 = vmatpush3.bf16.msra.mxu1 %v2913_v62 }
 0x72b   :  { %v1601_v63 = vpop.f32.mrb[32].mxu0  ;;  %v1642_v1 = vpop.f32.mrb[20].mxu1 }
 0x72c   :  { %v1603_v0 = vpop.f32.mrb[33].mxu0  ;;  %v1644_v2 = vpop.f32.mrb[21].mxu1 }
 0x72d   :  { %v1605_v3 = vpop.f32.mrb[34].mxu0  ;;  %v1646_v4 = vpop.f32.mrb[22].mxu1 }
 0x72e   :  { %v1606_v5 = vpop.f32.mrb[35].mxu0  ;;  %v1647_v6 = vpop.f32.mrb[23].mxu1 }
 0x74b   :  { %v1843_v7 = vpop.f32.mrb[36].mxu0  ;;  %v1884_v10 = vpop.f32.mrb[24].mxu1 }
 0x74c   :  { %v1844_v16 = vadd.f32 %v1843_v7, %v1601_v63  ;;  %v1885_v19 = vadd.f32 %v1884_v10, %v1642_v1  ;;  %v1845_v20 = vpop.f32.mrb[37].mxu0  ;;  %v1886_v21 = vpop.f32.mrb[25].mxu1 }
 0x74d   :  { %v1846_v23 = vadd.f32 %v1845_v20, %v1603_v0  ;;  %v1887_v24 = vadd.f32 %v1886_v21, %v1644_v2  ;;  %v1847_v25 = vpop.f32.mrb[38].mxu0  ;;  %v1888_v26 = vpop.f32.mrb[26].mxu1 }
 0x74e   :  { %v1914_v14 = vadd.f32 %v1897_v8, %v1844_v16  ;;  %v1916_v27 = vadd.f32 %v1905_v9, %v1885_v19  ;;  %v1848_v28 = vpop.f32.mrb[39].mxu0  ;;  %v1889_v15 = vpop.f32.mrb[27].mxu1 }
 0x74f   :  { %v1915_v29 = vadd.f32 %v1901_v11, %v1846_v23  ;;  %v1917_v30 = vadd.f32 %v1909_v12, %v1887_v24 }
 0x750   :  { %v1918_v31 = vmax.f32 %v1914_v14, 0.0  ;;  %v1920_v32 = vmax.f32 %v1916_v27, 0.0 }
 0x751   :  { %v1919_v17 = vmax.f32 %v1915_v29, 0.0  ;;  %v1921_v33 = vmax.f32 %v1917_v30, 0.0 }
 0x752   :  { %v1922_v34 = vpack.c.bf16 %v1918_v31, %v1918_v31  ;;  %v1924_v35 = vpack.c.bf16 %v1920_v32, %v1920_v32 }
 0x753   :  { %v1923_v13 = vpack.c.bf16 %v1919_v17, %v1919_v17  ;;  %v1925_v18 = vpack.c.bf16 %v1921_v33, %v1921_v33 }
 0x755   :  { %2215 = vmatprep.mubr.bf16.mxu0 %v1923_v13  ;;  %2255 = vmatprep.mubr.bf16.mxu1 %v1925_v18 }
 0x756   :  { %2216 = vmatmul.mubr.bf16.vlgmr.msra.gmra.mrb[40].mxu0 %v1922_v34  ;;  %2256 = vmatmul.mubr.bf16.vlgmr.msra.gmra.mrb[28].mxu1 %v1924_v35 }
 0x829   :  { %v2557_v36 = vpop.f32.mrb[40].mxu0  ;;  %v2579_v37 = vpop.f32.mrb[28].mxu1 }
 0x82a   :  { %v2558_v39 = vpop.f32.mrb[41].mxu0  ;;  %v2580_v40 = vpop.f32.mrb[29].mxu1 }
 0x82b   :  { %v2559_v41 = vadd.f32 %v2558_v39, %v2557_v36  ;;  %v2581_v42 = vadd.f32 %v2580_v40, %v2579_v37  ;;  %v2560_v43 = vpop.f32.mrb[42].mxu0  ;;  %v2582_v44 = vpop.f32.mrb[30].mxu1 }
 0x82c   :  { %v2561_v45 = vpop.f32.mrb[43].mxu0  ;;  %v2583_v46 = vpop.f32.mrb[31].mxu1 }
 0x82d   :  { %v2218_v47 = vadd.f32 %v2559_v41, %v1990_v38 }
 0x82f   :  { %v2258_v48 = vadd.f32 %v2581_v42, %v2218_v47 }
 0x831   :  { %2263 = vst [vmem:[%s3179_s5] sm:$0x3] %v2258_v48 }
 0x832   :  { %2268 = vsyncpa [#allocation3], 1 }
 0x833   :  { %2269 = vsyncpa [#allocation5], 1 }

</bundles_post_ra>
